<compile_context>
chip_gen: v5e
topology: v5e:2x2
jax: 0.10.0
libtpu: 0.0.40
codegen_flags: <defaults>
</compile_context>

<pallas_src>
import functools

import numpy as np
import jax
import jax.numpy as jnp
from jax import lax
from jax.experimental import pallas as pl
from jax.experimental.pallas import tpu as pltpu

# ----------------------- configuration (small, synthetic) -----------------------
CIN = 1          # channels of the (real/imag) image fed to the denoiser
C1 = 8           # hidden channels of the tiny denoiser
COUT = 1         # output channels
H = 16
W = 16
S = H * W        # 256 lanes per plane
S2 = 2 * S       # 512 lanes: real plane | imag plane, lane-concatenated
KH = KW = 3
NTAP = KH * KW               # 9
NTAP_PAD = 16                # sublane-aligned tap count for conv1's MXU operand
CENTER_TAP = (KH // 2) * KW + (KW // 2)   # tap with (dy, dx) == (0, 0)

# Static lane-roll amounts (rolled[p] = x[(p + dy*W + dx) mod S2]); the wrap that
# the circular roll introduces only ever lands on positions the boundary mask
# zeroes, so "same" zero padding is exact and planes never contaminate each other.
SHIFTS = tuple((-((ky - 1) * W + (kx - 1))) % S2
               for ky in range(KH) for kx in range(KW))


def _boundary_masks():
    """(NTAP, S2) f32 validity masks (zero-'same'-padding), precomputed on host."""
    lane = np.arange(S)
    row, col = lane // W, lane % W
    m = np.empty((NTAP, S), np.float32)
    t = 0
    for ky in range(KH):
        for kx in range(KW):
            dy, dx = ky - 1, kx - 1
            valid = ((col + dx >= 0) & (col + dx < W) &
                     (row + dy >= 0) & (row + dy < H))
            m[t] = valid.astype(np.float32)
            t += 1
    return np.tile(m, (1, 2))            # same per-plane pattern for both planes


# ----------------------------- Pallas kernel -------------------------------------
def _denoiser_kernel(norm, xr_ref, xi_ref, mask_ref, w1_ref, b1_ref,
                     w2t_ref, b2_ref, o_ref):
    """Single invocation, both planes fused.

    xr_ref, xi_ref : (CIN, S)            f32 VMEM  flattened real / imag planes
    mask_ref       : (NTAP, S2)          f32 VMEM  precomputed 0/1 padding masks
    w1_ref         : (C1, NTAP_PAD*CIN)  f32 VMEM  conv1 weights, cols = tap*CIN+ci (zero-padded)
    b1_ref         : (C1, 1)             f32 VMEM
    w2t_ref        : (NTAP*COUT, C1)     f32 VMEM  conv2 weights, rows = tap*COUT+o
    b2_ref         : (COUT, 1)           f32 VMEM
    o_ref          : (COUT, S2)          f32 VMEM  de-normalized output, lane-dense
    """
    xr = xr_ref[...]                                        # (CIN, S)
    xi = xi_ref[...]                                        # (CIN, S)

    def _minmax(v):                                         # global min/max of a plane
        lo = jnp.min(v, axis=1, keepdims=True)
        hi = jnp.max(v, axis=1, keepdims=True)
        if v.shape[0] > 1:
            lo = jnp.min(lo, axis=0, keepdims=True)
            hi = jnp.max(hi, axis=0, keepdims=True)
        return lo, hi                                       # (1, 1) each

    # ---- stand(): per-plane min/max normalization, fused in-kernel ----
    if norm:
        ar, br = _minmax(xr)
        ai, bi = _minmax(xi)
        sr = br - ar
        si = bi - ai
        # Guard vs. constant plane (reference would produce NaN/Inf; we return the
        # constant).  Denorm below still uses the raw scale.
        xr = (xr - ar) / jnp.where(sr == 0.0, jnp.float32(1.0), sr)
        xi = (xi - ai) / jnp.where(si == 0.0, jnp.float32(1.0), si)

    # ---- "torch.cat((real, imag), 0)" -> lane concatenation (shared conv weights) ----
    x = jnp.concatenate([xr, xi], axis=1)                   # (CIN, S2)
    mask = mask_ref[...]                                    # (NTAP, S2)

    # ---- conv1 (3x3 same) + ReLU : tap contraction on the MXU ----
    parts = []
    for t, sh in enumerate(SHIFTS):
        shifted = x if sh == 0 else pltpu.roll(x, sh, axis=1)
        if t != CENTER_TAP:
            shifted = shifted * mask[t:t + 1, :]            # zero "same" padding
        parts.append(shifted)
    parts.append(jnp.zeros(((NTAP_PAD - NTAP) * CIN, S2), jnp.float32))  # sublane-align K
    x_taps = jnp.concatenate(parts, axis=0)                 # (NTAP_PAD*CIN, S2)
    hidden = jnp.dot(w1_ref[...], x_taps,
                     preferred_element_type=jnp.float32,
                     precision=lax.Precision.HIGHEST) + b1_ref[...]
    hidden = jnp.maximum(hidden, 0.0)                       # (C1, S2)

    # ---- conv2 (3x3 same), W2^T-first: per-tap partials then roll+mask+sum ----
    partial = jnp.dot(w2t_ref[...], hidden,
                      preferred_element_type=jnp.float32,
                      precision=lax.Precision.HIGHEST)      # (NTAP*COUT, S2)
    out = partial[CENTER_TAP * COUT:(CENTER_TAP + 1) * COUT, :]   # center tap: no roll/mask
    for t, sh in enumerate(SHIFTS):
        if t == CENTER_TAP:
            continue
        slab = partial[t * COUT:(t + 1) * COUT, :]          # (COUT, S2), static slice
        slab = pltpu.roll(slab, sh, axis=1) * mask[t:t + 1, :]
        out = out + slab
    out = out + b2_ref[...]                                 # (COUT, S2)

    # ---- de-normalization fused in-kernel ----
    if norm:
        scale = jnp.concatenate([jnp.broadcast_to(sr, (COUT, S)),
                                 jnp.broadcast_to(si, (COUT, S))], axis=1)
        offset = jnp.concatenate([jnp.broadcast_to(ar, (COUT, S)),
                                  jnp.broadcast_to(ai, (COUT, S))], axis=1)
        out = out * scale + offset

    o_ref[...] = out                                        # single lane-dense store


# --------------------- one-time preprocessing (hoist out of FISTA loop) -----------
def prepare_denoiser(w1, b1, w2, b2):
    """Repack weights tap-major and build boundary masks ONCE per solver."""
    w1m = jnp.transpose(w1, (0, 2, 3, 1)).reshape(C1, NTAP * CIN)      # cols = tap*CIN+ci
    w1m = jnp.pad(w1m, ((0, 0), (0, (NTAP_PAD - NTAP) * CIN)))         # zero-pad K -> 16
    b1c = b1.reshape(C1, 1)
    w2t = jnp.transpose(w2, (2, 3, 0, 1)).reshape(NTAP * COUT, C1)     # rows = tap*COUT+o
    b2c = b2.reshape(COUT, 1)
    masks = jnp.asarray(_boundary_masks(), dtype=jnp.float32)          # (NTAP, S2)
    return (w1m, b1c, w2t, b2c, masks)


# ----------------------------- ComplexDenoiser forward ---------------------------
@functools.partial(jax.jit, static_argnames=("norm",))
def complex_denoiser(x, prepped, norm=True):
    """x: complex64 (1, CIN, H, W) -> complex64 (1, COUT, H, W)."""
    w1m, b1c, w2t, b2c, masks = prepped
    # Cheap per-call layout plumbing only (stand/pad/cat/denorm live in the kernel).
    xr = jnp.real(x).reshape(CIN, S).astype(jnp.float32)
    xi = jnp.imag(x).reshape(CIN, S).astype(jnp.float32)
    out = pl.pallas_call(
        functools.partial(_denoiser_kernel, norm),
        out_shape=jax.ShapeDtypeStruct((COUT, S2), jnp.float32),
        # no grid / BlockSpecs: whole arrays (<10 KiB total) live in VMEM, one step.
    )(xr, xi, masks, w1m, b1c, w2t, b2c)
    out = out.reshape(COUT, 2, H, W).transpose(1, 0, 2, 3)   # (2, COUT, H, W)
    # TODO(synk): complex dtype is not representable inside Pallas; recombine here.
    return (out[0:1] + 1j * out[1:2]).astype(jnp.complex64)


# ----------------------------- reference (pure JAX) -------------------------------
def _stand_ref(v):
    a = jnp.min(v)
    b = jnp.max(v)
    return (v - a) / (b - a), a, b


def _ref_forward(x, params, norm=True):
    w1, b1, w2, b2 = params
    xr = jnp.real(x)
    xi = jnp.imag(x)
    if norm:
        xr, ar, br = _stand_ref(xr)
        xi, ai, bi = _stand_ref(xi)
    batch = jnp.concatenate((xr, xi), axis=0)
    dn = lax.conv_dimension_numbers(batch.shape, w1.shape, ("NCHW", "OIHW", "NCHW"))
    h = lax.conv_general_dilated(batch, w1, (1, 1), "SAME", dimension_numbers=dn,
                                 precision=lax.Precision.HIGHEST)
    h = jnp.maximum(h + b1[None, :, None, None], 0.0)
    dn2 = lax.conv_dimension_numbers(h.shape, w2.shape, ("NCHW", "OIHW", "NCHW"))
    o = lax.conv_general_dilated(h, w2, (1, 1), "SAME", dimension_numbers=dn2,
                                 precision=lax.Precision.HIGHEST)
    o = o + b2[None, :, None, None]
    if norm:
        return (o[0:1] * (br - ar) + ar) + 1j * (o[1:2] * (bi - ai) + ai)
    return o[0:1] + 1j * o[1:2]


# ------------------------------------- main ---------------------------------------
if __name__ == "__main__":
    key = jax.random.PRNGKey(0)
    k_xr, k_xi, k_w1, k_b1, k_w2, k_b2 = jax.random.split(key, 6)

    # deterministic synthetic denoiser parameters
    w1 = 0.1 * jax.random.normal(k_w1, (C1, CIN, KH, KW), dtype=jnp.float32)
    b1 = 0.01 * jax.random.normal(k_b1, (C1,), dtype=jnp.float32)
    w2 = 0.1 * jax.random.normal(k_w2, (COUT, C1, KH, KW), dtype=jnp.float32)
    b2 = 0.01 * jax.random.normal(k_b2, (COUT,), dtype=jnp.float32)
    params = (w1, b1, w2, b2)
    prepped = prepare_denoiser(*params)          # hoisted: once, not per iteration

    # complex input, batch of 1 (the module slices [0:1]/[1:2] of the stacked batch)
    x_real = jax.random.normal(k_xr, (1, CIN, H, W), dtype=jnp.float32)
    x_imag = jax.random.normal(k_xi, (1, CIN, H, W), dtype=jnp.float32)
    x = (x_real + 1j * x_imag).astype(jnp.complex64)

    out = jax.block_until_ready(complex_denoiser(x, prepped, norm=True))
    ref = _ref_forward(x, params, norm=True)
    assert out.shape == (1, COUT, H, W) and out.dtype == jnp.complex64
    # With Precision.HIGHEST on both sides agreement is ~1e-6; 5e-3 leaves margin
    # for matmul-pass/reduction-order differences while still catching structural
    # bugs (those are O(0.1-1)).  Much tighter than the previous 2e-2.
    assert jnp.allclose(jnp.real(out), jnp.real(ref), atol=5e-3, rtol=5e-3)
    assert jnp.allclose(jnp.imag(out), jnp.imag(ref), atol=5e-3, rtol=5e-3)

    # also exercise the norm=False branch
    out_nn = jax.block_until_ready(complex_denoiser(x, prepped, norm=False))
    ref_nn = _ref_forward(x, params, norm=False)
    assert jnp.allclose(jnp.real(out_nn), jnp.real(ref_nn), atol=5e-3, rtol=5e-3)
    assert jnp.allclose(jnp.imag(out_nn), jnp.imag(ref_nn), atol=5e-3, rtol=5e-3)

    print("KERNEL_OK")
</pallas_src>

<mosaic_0001>
module attributes {stable_mosaic.version = 11 : i64} {
  func.func @_denoiser_kernel(%arg0: memref<1x256xf32, #tpu.memory_space<vmem>>, %arg1: memref<1x256xf32, #tpu.memory_space<vmem>>, %arg2: memref<9x512xf32, #tpu.memory_space<vmem>>, %arg3: memref<8x16xf32, #tpu.memory_space<vmem>>, %arg4: memref<8x1xf32, #tpu.memory_space<vmem>>, %arg5: memref<9x8xf32, #tpu.memory_space<vmem>>, %arg6: memref<1x1xf32, #tpu.memory_space<vmem>>, %arg7: memref<1x512xf32, #tpu.memory_space<vmem>>) attributes {dimension_semantics = [], scalar_prefetch = 0 : i64, scratch_operands = 0 : i64, tpu.core_type = #tpu.core_type<tc>} {
    %c0 = arith.constant 0 : index
    %c0_0 = arith.constant 0 : index
    %0 = vector.load %arg0[%c0, %c0_0] : memref<1x256xf32, #tpu.memory_space<vmem>>, vector<1x256xf32>
    %c0_1 = arith.constant 0 : index
    %c0_2 = arith.constant 0 : index
    %1 = vector.load %arg1[%c0_1, %c0_2] : memref<1x256xf32, #tpu.memory_space<vmem>>, vector<1x256xf32>
    %cst = arith.constant dense<0x7F800000> : vector<1xf32>
    %2 = vector.multi_reduction <minimumf>, %0, %cst [1] : vector<1x256xf32> to vector<1xf32>
    %3 = vector.shape_cast %2 : vector<1xf32> to vector<1x1xf32>
    %cst_3 = arith.constant dense<0xFF800000> : vector<1xf32>
    %4 = vector.multi_reduction <maximumf>, %0, %cst_3 [1] : vector<1x256xf32> to vector<1xf32>
    %5 = vector.shape_cast %4 : vector<1xf32> to vector<1x1xf32>
    %cst_4 = arith.constant dense<0x7F800000> : vector<1xf32>
    %6 = vector.multi_reduction <minimumf>, %1, %cst_4 [1] : vector<1x256xf32> to vector<1xf32>
    %7 = vector.shape_cast %6 : vector<1xf32> to vector<1x1xf32>
    %cst_5 = arith.constant dense<0xFF800000> : vector<1xf32>
    %8 = vector.multi_reduction <maximumf>, %1, %cst_5 [1] : vector<1x256xf32> to vector<1xf32>
    %9 = vector.shape_cast %8 : vector<1xf32> to vector<1x1xf32>
    %10 = arith.subf %5, %3 : vector<1x1xf32>
    %11 = arith.subf %9, %7 : vector<1x1xf32>
    %12 = vector.broadcast %3 : vector<1x1xf32> to vector<1x256xf32>
    %13 = arith.subf %0, %12 : vector<1x256xf32>
    %cst_6 = arith.constant 0.000000e+00 : f32
    %14 = vector.broadcast %cst_6 : f32 to vector<1x1xf32>
    %15 = arith.cmpf oeq, %10, %14 : vector<1x1xf32>
    %cst_7 = arith.constant 1.000000e+00 : f32
    %16 = vector.broadcast %cst_7 : f32 to vector<1x1xf32>
    %17 = arith.select %15, %16, %10 : vector<1x1xi1>, vector<1x1xf32>
    %18 = vector.broadcast %17 : vector<1x1xf32> to vector<1x256xf32>
    %19 = arith.divf %13, %18 : vector<1x256xf32>
    %20 = vector.broadcast %7 : vector<1x1xf32> to vector<1x256xf32>
    %21 = arith.subf %1, %20 : vector<1x256xf32>
    %cst_8 = arith.constant 0.000000e+00 : f32
    %22 = vector.broadcast %cst_8 : f32 to vector<1x1xf32>
    %23 = arith.cmpf oeq, %11, %22 : vector<1x1xf32>
    %cst_9 = arith.constant 1.000000e+00 : f32
    %24 = vector.broadcast %cst_9 : f32 to vector<1x1xf32>
    %25 = arith.select %23, %24, %11 : vector<1x1xi1>, vector<1x1xf32>
    %26 = vector.broadcast %25 : vector<1x1xf32> to vector<1x256xf32>
    %27 = arith.divf %21, %26 : vector<1x256xf32>
    %28 = tpu.concatenate %19, %27 in 1 : vector<1x256xf32>, vector<1x256xf32> -> vector<1x512xf32>
    %c0_10 = arith.constant 0 : index
    %c0_11 = arith.constant 0 : index
    %29 = vector.load %arg2[%c0_10, %c0_11] : memref<9x512xf32, #tpu.memory_space<vmem>>, vector<9x512xf32>
    %c17_i32 = arith.constant 17 : i32
    %30 = tpu.dynamic_rotate %28 by %c17_i32 dim 1 : vector<1x512xf32>, i32 -> vector<1x512xf32>
    %31 = vector.extract_strided_slice %29 {offsets = [0, 0], sizes = [1, 512], strides = [1, 1]} : vector<9x512xf32> to vector<1x512xf32>
    %32 = arith.mulf %30, %31 : vector<1x512xf32>
    %c16_i32 = arith.constant 16 : i32
    %33 = tpu.dynamic_rotate %28 by %c16_i32 dim 1 : vector<1x512xf32>, i32 -> vector<1x512xf32>
    %34 = vector.extract_strided_slice %29 {offsets = [1, 0], sizes = [1, 512], strides = [1, 1]} : vector<9x512xf32> to vector<1x512xf32>
    %35 = arith.mulf %33, %34 : vector<1x512xf32>
    %c15_i32 = arith.constant 15 : i32
    %36 = tpu.dynamic_rotate %28 by %c15_i32 dim 1 : vector<1x512xf32>, i32 -> vector<1x512xf32>
    %37 = vector.extract_strided_slice %29 {offsets = [2, 0], sizes = [1, 512], strides = [1, 1]} : vector<9x512xf32> to vector<1x512xf32>
    %38 = arith.mulf %36, %37 : vector<1x512xf32>
    %c1_i32 = arith.constant 1 : i32
    %39 = tpu.dynamic_rotate %28 by %c1_i32 dim 1 : vector<1x512xf32>, i32 -> vector<1x512xf32>
    %40 = vector.extract_strided_slice %29 {offsets = [3, 0], sizes = [1, 512], strides = [1, 1]} : vector<9x512xf32> to vector<1x512xf32>
    %41 = arith.mulf %39, %40 : vector<1x512xf32>
    %c511_i32 = arith.constant 511 : i32
    %42 = tpu.dynamic_rotate %28 by %c511_i32 dim 1 : vector<1x512xf32>, i32 -> vector<1x512xf32>
    %43 = vector.extract_strided_slice %29 {offsets = [5, 0], sizes = [1, 512], strides = [1, 1]} : vector<9x512xf32> to vector<1x512xf32>
    %44 = arith.mulf %42, %43 : vector<1x512xf32>
    %c497_i32 = arith.constant 497 : i32
    %45 = tpu.dynamic_rotate %28 by %c497_i32 dim 1 : vector<1x512xf32>, i32 -> vector<1x512xf32>
    %46 = vector.extract_strided_slice %29 {offsets = [6, 0], sizes = [1, 512], strides = [1, 1]} : vector<9x512xf32> to vector<1x512xf32>
    %47 = arith.mulf %45, %46 : vector<1x512xf32>
    %c496_i32 = arith.constant 496 : i32
    %48 = tpu.dynamic_rotate %28 by %c496_i32 dim 1 : vector<1x512xf32>, i32 -> vector<1x512xf32>
    %49 = vector.extract_strided_slice %29 {offsets = [7, 0], sizes = [1, 512], strides = [1, 1]} : vector<9x512xf32> to vector<1x512xf32>
    %50 = arith.mulf %48, %49 : vector<1x512xf32>
    %c495_i32 = arith.constant 495 : i32
    %51 = tpu.dynamic_rotate %28 by %c495_i32 dim 1 : vector<1x512xf32>, i32 -> vector<1x512xf32>
    %52 = vector.extract_strided_slice %29 {offsets = [8, 0], sizes = [1, 512], strides = [1, 1]} : vector<9x512xf32> to vector<1x512xf32>
    %53 = arith.mulf %51, %52 : vector<1x512xf32>
    %cst_12 = arith.constant 0.000000e+00 : f32
    %54 = vector.broadcast %cst_12 : f32 to vector<7x512xf32>
    %55 = tpu.concatenate %32, %35, %38, %41, %28, %44, %47, %50, %53, %54 in 0 : vector<1x512xf32>, vector<1x512xf32>, vector<1x512xf32>, vector<1x512xf32>, vector<1x512xf32>, vector<1x512xf32>, vector<1x512xf32>, vector<1x512xf32>, vector<1x512xf32>, vector<7x512xf32> -> vector<16x512xf32>
    %c0_13 = arith.constant 0 : index
    %c0_14 = arith.constant 0 : index
    %56 = vector.load %arg3[%c0_13, %c0_14] : memref<8x16xf32, #tpu.memory_space<vmem>>, vector<8x16xf32>
    %cst_15 = arith.constant dense<0.000000e+00> : vector<8x512xf32>
    %57 = tpu.matmul %56, %55, %cst_15 {dimension_numbers = #tpu.dot_dimension_numbers<[1], [0], [0], [1], [0, 0, 1, 1], [], []>, precision = #tpu.contract_precision<fp32>} : vector<8x16xf32>, vector<16x512xf32>, vector<8x512xf32> -> vector<8x512xf32>
    %c0_16 = arith.constant 0 : index
    %c0_17 = arith.constant 0 : index
    %58 = vector.load %arg4[%c0_16, %c0_17] : memref<8x1xf32, #tpu.memory_space<vmem>>, vector<8x1xf32>
    %59 = vector.broadcast %58 : vector<8x1xf32> to vector<8x512xf32>
    %60 = arith.addf %57, %59 : vector<8x512xf32>
    %cst_18 = arith.constant 0.000000e+00 : f32
    %61 = vector.broadcast %cst_18 : f32 to vector<8x512xf32>
    %62 = arith.maximumf %60, %61 : vector<8x512xf32>
    %c0_19 = arith.constant 0 : index
    %c0_20 = arith.constant 0 : index
    %63 = vector.load %arg5[%c0_19, %c0_20] : memref<9x8xf32, #tpu.memory_space<vmem>>, vector<9x8xf32>
    %cst_21 = arith.constant dense<0.000000e+00> : vector<9x512xf32>
    %64 = tpu.matmul %63, %62, %cst_21 {dimension_numbers = #tpu.dot_dimension_numbers<[1], [0], [0], [1], [0, 0, 1, 1], [], []>, precision = #tpu.contract_precision<fp32>} : vector<9x8xf32>, vector<8x512xf32>, vector<9x512xf32> -> vector<9x512xf32>
    %65 = vector.extract_strided_slice %64 {offsets = [4, 0], sizes = [1, 512], strides = [1, 1]} : vector<9x512xf32> to vector<1x512xf32>
    %66 = vector.extract_strided_slice %64 {offsets = [0, 0], sizes = [1, 512], strides = [1, 1]} : vector<9x512xf32> to vector<1x512xf32>
    %c17_i32_22 = arith.constant 17 : i32
    %67 = tpu.dynamic_rotate %66 by %c17_i32_22 dim 1 : vector<1x512xf32>, i32 -> vector<1x512xf32>
    %68 = vector.extract_strided_slice %29 {offsets = [0, 0], sizes = [1, 512], strides = [1, 1]} : vector<9x512xf32> to vector<1x512xf32>
    %69 = arith.mulf %67, %68 : vector<1x512xf32>
    %70 = arith.addf %65, %69 : vector<1x512xf32>
    %71 = vector.extract_strided_slice %64 {offsets = [1, 0], sizes = [1, 512], strides = [1, 1]} : vector<9x512xf32> to vector<1x512xf32>
    %c16_i32_23 = arith.constant 16 : i32
    %72 = tpu.dynamic_rotate %71 by %c16_i32_23 dim 1 : vector<1x512xf32>, i32 -> vector<1x512xf32>
    %73 = vector.extract_strided_slice %29 {offsets = [1, 0], sizes = [1, 512], strides = [1, 1]} : vector<9x512xf32> to vector<1x512xf32>
    %74 = arith.mulf %72, %73 : vector<1x512xf32>
    %75 = arith.addf %70, %74 : vector<1x512xf32>
    %76 = vector.extract_strided_slice %64 {offsets = [2, 0], sizes = [1, 512], strides = [1, 1]} : vector<9x512xf32> to vector<1x512xf32>
    %c15_i32_24 = arith.constant 15 : i32
    %77 = tpu.dynamic_rotate %76 by %c15_i32_24 dim 1 : vector<1x512xf32>, i32 -> vector<1x512xf32>
    %78 = vector.extract_strided_slice %29 {offsets = [2, 0], sizes = [1, 512], strides = [1, 1]} : vector<9x512xf32> to vector<1x512xf32>
    %79 = arith.mulf %77, %78 : vector<1x512xf32>
    %80 = arith.addf %75, %79 : vector<1x512xf32>
    %81 = vector.extract_strided_slice %64 {offsets = [3, 0], sizes = [1, 512], strides = [1, 1]} : vector<9x512xf32> to vector<1x512xf32>
    %c1_i32_25 = arith.constant 1 : i32
    %82 = tpu.dynamic_rotate %81 by %c1_i32_25 dim 1 : vector<1x512xf32>, i32 -> vector<1x512xf32>
    %83 = vector.extract_strided_slice %29 {offsets = [3, 0], sizes = [1, 512], strides = [1, 1]} : vector<9x512xf32> to vector<1x512xf32>
    %84 = arith.mulf %82, %83 : vector<1x512xf32>
    %85 = arith.addf %80, %84 : vector<1x512xf32>
    %86 = vector.extract_strided_slice %64 {offsets = [5, 0], sizes = [1, 512], strides = [1, 1]} : vector<9x512xf32> to vector<1x512xf32>
    %c511_i32_26 = arith.constant 511 : i32
    %87 = tpu.dynamic_rotate %86 by %c511_i32_26 dim 1 : vector<1x512xf32>, i32 -> vector<1x512xf32>
    %88 = vector.extract_strided_slice %29 {offsets = [5, 0], sizes = [1, 512], strides = [1, 1]} : vector<9x512xf32> to vector<1x512xf32>
    %89 = arith.mulf %87, %88 : vector<1x512xf32>
    %90 = arith.addf %85, %89 : vector<1x512xf32>
    %91 = vector.extract_strided_slice %64 {offsets = [6, 0], sizes = [1, 512], strides = [1, 1]} : vector<9x512xf32> to vector<1x512xf32>
    %c497_i32_27 = arith.constant 497 : i32
    %92 = tpu.dynamic_rotate %91 by %c497_i32_27 dim 1 : vector<1x512xf32>, i32 -> vector<1x512xf32>
    %93 = vector.extract_strided_slice %29 {offsets = [6, 0], sizes = [1, 512], strides = [1, 1]} : vector<9x512xf32> to vector<1x512xf32>
    %94 = arith.mulf %92, %93 : vector<1x512xf32>
    %95 = arith.addf %90, %94 : vector<1x512xf32>
    %96 = vector.extract_strided_slice %64 {offsets = [7, 0], sizes = [1, 512], strides = [1, 1]} : vector<9x512xf32> to vector<1x512xf32>
    %c496_i32_28 = arith.constant 496 : i32
    %97 = tpu.dynamic_rotate %96 by %c496_i32_28 dim 1 : vector<1x512xf32>, i32 -> vector<1x512xf32>
    %98 = vector.extract_strided_slice %29 {offsets = [7, 0], sizes = [1, 512], strides = [1, 1]} : vector<9x512xf32> to vector<1x512xf32>
    %99 = arith.mulf %97, %98 : vector<1x512xf32>
    %100 = arith.addf %95, %99 : vector<1x512xf32>
    %101 = vector.extract_strided_slice %64 {offsets = [8, 0], sizes = [1, 512], strides = [1, 1]} : vector<9x512xf32> to vector<1x512xf32>
    %c495_i32_29 = arith.constant 495 : i32
    %102 = tpu.dynamic_rotate %101 by %c495_i32_29 dim 1 : vector<1x512xf32>, i32 -> vector<1x512xf32>
    %103 = vector.extract_strided_slice %29 {offsets = [8, 0], sizes = [1, 512], strides = [1, 1]} : vector<9x512xf32> to vector<1x512xf32>
    %104 = arith.mulf %102, %103 : vector<1x512xf32>
    %105 = arith.addf %100, %104 : vector<1x512xf32>
    %c0_30 = arith.constant 0 : index
    %c0_31 = arith.constant 0 : index
    %106 = vector.load %arg6[%c0_30, %c0_31] : memref<1x1xf32, #tpu.memory_space<vmem>>, vector<1x1xf32>
    %107 = vector.broadcast %106 : vector<1x1xf32> to vector<1x512xf32>
    %108 = arith.addf %105, %107 : vector<1x512xf32>
    %109 = vector.shape_cast %10 : vector<1x1xf32> to vector<1x1xf32>
    %110 = vector.broadcast %109 : vector<1x1xf32> to vector<1x256xf32>
    %111 = vector.shape_cast %11 : vector<1x1xf32> to vector<1x1xf32>
    %112 = vector.broadcast %111 : vector<1x1xf32> to vector<1x256xf32>
    %113 = tpu.concatenate %110, %112 in 1 : vector<1x256xf32>, vector<1x256xf32> -> vector<1x512xf32>
    %114 = vector.shape_cast %3 : vector<1x1xf32> to vector<1x1xf32>
    %115 = vector.broadcast %114 : vector<1x1xf32> to vector<1x256xf32>
    %116 = vector.shape_cast %7 : vector<1x1xf32> to vector<1x1xf32>
    %117 = vector.broadcast %116 : vector<1x1xf32> to vector<1x256xf32>
    %118 = tpu.concatenate %115, %117 in 1 : vector<1x256xf32>, vector<1x256xf32> -> vector<1x512xf32>
    %119 = arith.mulf %108, %113 : vector<1x512xf32>
    %120 = arith.addf %119, %118 : vector<1x512xf32>
    %c0_32 = arith.constant 0 : index
    %c0_33 = arith.constant 0 : index
    %121 = vector.load %arg7[%c0_32, %c0_33] : memref<1x512xf32, #tpu.memory_space<vmem>>, vector<1x512xf32>
    tpu.vector_store %arg7[%c0_32, %c0_33], %120 {strides = array<i32>} : memref<1x512xf32, #tpu.memory_space<vmem>>, vector<1x512xf32>,
    return
  }
}

</mosaic_0001>

<bundles_post_ra>
// kernel: custom-call.1
= control target key start
LH: loop header
LB: loop body
LE: loop exit
PB: predicated region body
PF: predicated region fallthrough
CT: control target
= control target key end

     0   :  { %s56_s0 = inlined_call_operand.hbm [shape: c64[1,1,16,16], index: 0, kind: input, shape index: {}]   ;;  %s57_s1 = inlined_call_operand.vmem [shape: f32[1,1,16,16], index: 1, kind: output, shape index: {}]  }
   0x1   :  { %s2_s8 = scalar_lea.hbm %s56_s0, 16 }
   0x2   :  { %3 = vsyncpa [#allocation0], 0  ;;  %s5_s9 = sshll.u32 %s2_s8, 4  ;;  %s7_s12 = sshll.u32 %s57_s1, 4  ;;  %s6_s9 = int_to_ptr.hbm [resolvable:$true] %s5_s9  ;;  %s8_s12 = int_to_ptr.vmem [resolvable:$true] %s7_s12 }
   0x3   :  { %10 = dma.hbm_to_vmem [thread:$0]  %s6_s9, 256, %s8_s12, [#allocation0] }
   0x4   :  { %38 = dma.done.wait [#allocation0], 256  }
   0x5   :  { %39 = vsyncadd [#allocation0], 4294967040 }
   0x6   :  { %13 = vsyncpa [#allocation0], 1 }

// kernel: custom-call
= control target key start
LH: loop header
LB: loop body
LE: loop exit
PB: predicated region body
PF: predicated region fallthrough
CT: control target
= control target key end

     0   :  { %2 = vsyncpa [#allocation0], 0  ;;  %s55_s0 = inlined_call_operand.hbm [shape: c64[1,1,16,16], index: 0, kind: input, shape index: {}]   ;;  %s56_s1 = inlined_call_operand.vmem [shape: f32[1,1,16,16], index: 1, kind: output, shape index: {}]  }
   0x1   :  { %s4_s8 = sshll.u32 %s55_s0, 4  ;;  %s6_s11 = sshll.u32 %s56_s1, 4  ;;  %s5_s8 = int_to_ptr.hbm [resolvable:$true] %s4_s8  ;;  %s7_s11 = int_to_ptr.vmem [resolvable:$true] %s6_s11 }
   0x2   :  { %9 = dma.hbm_to_vmem [thread:$0]  %s5_s8, 256, %s7_s11, [#allocation0] }
   0x3   :  { %37 = dma.done.wait [#allocation0], 256  }
   0x4   :  { %38 = vsyncadd [#allocation0], 4294967040 }
   0x5   :  { %12 = vsyncpa [#allocation0], 1 }

// kernel: custom-call.2
= control target key start
LH: loop header
LB: loop body
LE: loop exit
PB: predicated region body
PF: predicated region fallthrough
CT: control target
= control target key end

     0   :  { %s105_s0 = inlined_call_operand.vmem [shape: f32[1,1,16,16], index: 0, kind: input, shape index: {}]   ;;  %s106_s1 = inlined_call_operand.vmem [shape: f32[1,1,16,16], index: 1, kind: input, shape index: {}]   ;;  %s107_s2 = inlined_call_operand.hbm [shape: c64[1,1,16,16], index: 2, kind: output, shape index: {}]  }
   0x1   :  { %s3_s11 = scalar_lea.hbm %s107_s2, 16 }
   0x2   :  { %4 = vsyncpa [#allocation0], 0  ;;  %s6_s14 = sshll.u32 %s105_s0, 4  ;;  %s8_s17 = sshll.u32 %s107_s2, 4  ;;  %s7_s14 = int_to_ptr.vmem [resolvable:$true] %s6_s14  ;;  %s9_s17 = int_to_ptr.hbm [resolvable:$true] %s8_s17 }
   0x3   :  { %11 = dma.vmem_to_hbm [thread:$0]  %s7_s14, 256, %s9_s17, [#allocation0] }
   0x4   :  { %74 = dma.done.wait [#allocation0], 256  }
   0x5   :  { %75 = vsyncadd [#allocation0], 4294967040 }
   0x6   :  { %14 = vsyncpa [#allocation0], 1 }
   0x7   :  { %15 = vsyncpa [#allocation1], 0  ;;  %s17_s20 = sshll.u32 %s106_s1, 4  ;;  %s19_s21 = sshll.u32 %s3_s11, 4  ;;  %s18_s20 = int_to_ptr.vmem [resolvable:$true] %s17_s20  ;;  %s20_s21 = int_to_ptr.hbm [resolvable:$true] %s19_s21 }
   0x8   :  { %22 = dma.vmem_to_hbm [thread:$0]  %s18_s20, 256, %s20_s21, [#allocation1] }
   0x9   :  { %76 = dma.done.wait [#allocation1], 256  }
   0xa   :  { %77 = vsyncadd [#allocation1], 4294967040 }
   0xb   :  { %25 = vsyncpa [#allocation1], 1 }

// kernel: complex_denoiser.1
= control target key start
LH: loop header
LB: loop body
LE: loop exit
PB: predicated region body
PF: predicated region fallthrough
CT: control target
= control target key end

     0   :  { %s3137_s0 = inlined_call_operand.vmem [shape: f32[1,256], index: 0, kind: input, shape index: {}]   ;;  %s3138_s1 = inlined_call_operand.vmem [shape: f32[1,256], index: 1, kind: input, shape index: {}]   ;;  %s3139_s2 = inlined_call_operand.vmem [shape: f32[9,512], index: 2, kind: input, shape index: {}]   ;;  %s3140_s3 = inlined_call_operand.hbm [shape: f32[8,16], index: 3, kind: input, shape index: {}]   ;;  %s3141_s4 = inlined_call_operand.vmem [shape: f32[8,1], index: 4, kind: input, shape index: {}]   ;;  %s3142_s5 = inlined_call_operand.vmem [shape: f32[9,8], index: 5, kind: input, shape index: {}]   ;;  %s3143_s6 = inlined_call_operand.<no memory space> [shape: f32[1,1], index: 6, kind: input, shape index: {}]   ;;  %s3144_s7 = inlined_call_operand.vmem [shape: f32[1,512], index: 7, kind: output, shape index: {}]  }
   0x1   :  { %v12_v0 = vstv %s3143_s6 }
   0x2   :  { %13 = vst [vmem:[#allocation2] sm:$0x1] %v12_v0 }
   0x3   :  { %14 = vsyncpa [#allocation4], 0  ;;  %s26_s28 = sshll.u32 %s3140_s3, 4  ;;  %s2227_s29 = smov [#allocation3]   ;;  %s27_s28 = int_to_ptr.hbm [resolvable:$true] %s26_s28 }
   0x4   :  { %s28_s30 = sshll.u32 %s2227_s29, 4  ;;  %s29_s30 = int_to_ptr.vmem [resolvable:$true] %s28_s30 }
   0x5   :  { %31 = dma.hbm_to_vmem [thread:$0]  %s27_s28, 128, %s29_s30, [#allocation4]  }
   0x6   :  { %2225 = dma.done.wait [#allocation4], 128  }
   0x7   :  { %2226 = vsyncadd [#allocation4], 4294967168  ;;  %v43_v1 = vld [vmem:[%s3138_s1] sm:$0x3]  ;;  %vm49_vm0 = vcmask 1040384   ;;  %s2229_s1 = smov 16  }
   0x8   :  { %v42_v2 = vld [vmem:[%s3137_s0] sm:$0x3]  ;;  %v61_v3 = vperm.slane %v43_v1, 0  ;;  %v62_v4 = vperm.slane %v43_v1, 1  ;;  %s2228_s0 = smov 15   ;;  %s2230_s3 = smov 127  }
   0x9   :  { %v45_v5 = vperm.slane %v42_v2, 0  ;;  %v46_v6 = vperm.slane %v42_v2, 1  ;;  %s2231_s11 = smov 1   ;;  %s2232_s12 = smov 112  }
   0xa   :  { %v65_v7 = vsel %vm49_vm0, %v61_v3, inf  ;;  %v66_v8 = vsel %vm49_vm0, %v62_v4, inf  ;;  %v70_v13 = vsel %vm49_vm0, %v61_v3, -inf  ;;  %v71_v14 = vsel %vm49_vm0, %v62_v4, -inf  ;;  %s2233_s13 = smov 113   ;;  %s2234_s14 = smov 17  }
   0xb   :  { %v50_v9 = vsel %vm49_vm0, %v45_v5, inf  ;;  %v51_v10 = vsel %vm49_vm0, %v46_v6, inf  ;;  %v67_v11 = vmin.f32 %v65_v7, %v66_v8  ;;  %v55_v15 = vsel %vm49_vm0, %v45_v5, -inf  ;;  %s2235_s15 = smov 111   ;;  %v2405_v4 = vld [vmem:[%s3139_s2] sm:$0xff] }
   0xc   :  { %v52_v12 = vmin.f32 %v50_v9, %v51_v10  ;;  %v56_v16 = vsel %vm49_vm0, %v46_v6, -inf  ;;  %v72_v17 = vmax.f32 %v70_v13, %v71_v14  ;;  %v179_v7 = vrot.slane %v2405_v4, 1 }
   0xd   :  { %68 = vmin.xlane.f32.xlu1 %v67_v11  ;;  %v57_v18 = vmax.f32 %v55_v15, %v56_v16  ;;  %v204_v9 = vrot.slane %v2405_v4, 2  ;;  %v3149_v11 = vrot.slane %v2405_v4, 3 }
   0xe   :  { %53 = vmin.xlane.f32.xlu0 %v52_v12 }
  0x15   :  { %73 = vmax.xlane.f32.xlu1 %v72_v17 }
  0x16   :  { %58 = vmax.xlane.f32.xlu0 %v57_v18 }
  0x80   :  { %v2297_v19 = vpop.xlane.xlu1 %68 }
  0x81   :  { %v2299_v20 = vpop.xlane.xlu0 %53  ;;  %v102_v34 = vperm.slane %v2297_v19, 0 }
  0x82   :  { %v78_v40 = vperm.slane %v2299_v20, 0 }
  0x83   :  { %v104_v46 = vsub.f32 %v43_v1, %v102_v34  ;;  %v3145_v1 = vlaneseq  ;;  %v3148_v34 = vrot.slane %v2405_v4, 7 }
  0x84   :  { %v80_v49 = vsub.f32 %v42_v2, %v78_v40 }
  0x85   :  { %v2398_v2 = vand.u32 127, %v3145_v1 }
  0x87   :  { %vm170_vm11 = vcmp.lt.s32.totalorder %v2398_v2, 16  ;;  %vm199_vm12 = vcmp.lt.s32.totalorder %v2398_v2, 15  ;;  %vm153_vm13 = vcmp.lt.s32.totalorder %v2398_v2, 17  ;;  %vm224_vm14 = vcmp.lt.s32.totalorder %v2398_v2, 1 }
  0x88   :  { %v74_v21 = vpop.xlane.xlu1 %73  ;;  %vm249_vm15 = vcmp.lt.s32.totalorder %v2398_v2, 127 }
  0x89   :  { %v59_v22 = vpop.xlane.xlu0 %58  ;;  %v2302_v23 = vsub.f32 %v74_v21, %v2297_v19  ;;  %v451_v21 = vld [vmem:[#allocation3] sm:$0xff] }
  0x8a   :  { %v2305_v24 = vsub.f32 %v59_v22, %v2299_v20 }
  0x8b   :  { %vm105_vm1 = vcmp.eq.f32.partialorder %v2302_v23, 0.0 }
  0x8c   :  { %vm81_vm2 = vcmp.eq.f32.partialorder %v2305_v24, 0.0  ;;  %v106_v25 = vsel %vm105_vm1, 1.0, %v2302_v23  ;;  %vm458_vm1 = vcmask 130048  }
  0x8d   :  { %v82_v26 = vsel %vm81_vm2, 1.0, %v2305_v24  ;;  %v108_v27 = vperm.slane %v106_v25, 0  ;;  %vm417_vm2 = vcmask 1041408  }
  0x8e   :  { %v84_v28 = vperm.slane %v82_v26, 0  ;;  %v254_v26 = vrot.slane %v2405_v4, 5 }
  0x8f   :  { %2189 = vrcp.f32 %v108_v27  ;;  %v121_v35 = vand.u32 2147483648, %v108_v27  ;;  %v119_v38 = vand.u32 2147483647, %v108_v27  ;;  %vm115_vm5 = vweird.f32 %v108_v27 }
  0x90   :  { %2191 = vrcp.f32 %v84_v28  ;;  %v97_v39 = vand.u32 2147483648, %v84_v28  ;;  %v95_v42 = vand.u32 2147483647, %v84_v28  ;;  %vm91_vm7 = vweird.f32 %v84_v28 }
  0x91   :  { %v122_v44 = vor.u32 1.1754944e-38, %v121_v35  ;;  %vm120_vm8 = vcmp.eq.f32.partialorder %v119_v38, 8.507059e+37  ;;  %v3151_v35 = vrot.slane %v2405_v4, 6 }
  0x92   :  { %v98_v48 = vor.u32 1.1754944e-38, %v97_v39  ;;  %vm96_vm10 = vcmp.eq.f32.partialorder %v95_v42, 8.507059e+37 }
  0x95   :  { %v2190_v29 = vpop.eup %2189 }
  0x96   :  { %v2192_v30 = vpop.eup %2191  ;;  %v111_v31 = vmul.f32 %v2190_v29, %v108_v27  ;;  %vm116_vm3 = vweird.f32 %v2190_v29 }
  0x97   :  { %v87_v32 = vmul.f32 %v2192_v30, %v84_v28  ;;  %vm92_vm4 = vweird.f32 %v2192_v30  ;;  %vm117_vm6 = vmor %vm115_vm5, %vm116_vm3  ;;  %vm422_vm3 = vcmask 1042432   ;;  %vm274_vm5 = vcmp.lt.s32.totalorder %v2398_v2, 113 }
  0x98   :  { %v112_v33 = vsub.f32 1.0, %v111_v31  ;;  %vm93_vm9 = vmor %vm91_vm7, %vm92_vm4  ;;  %vm299_vm4 = vcmp.lt.s32.totalorder %v2398_v2, 112  ;;  %vm432_vm7 = vcmask 1044480  }
  0x99   :  { %v88_v36 = vsub.f32 1.0, %v87_v32 }
  0x9a   :  { %v113_v37 = vmul.f32 %v2190_v29, %v112_v33 }
  0x9b   :  { %v89_v41 = vmul.f32 %v2192_v30, %v88_v36 }
  0x9c   :  { %v114_v43 = vadd.f32 %v2190_v29, %v113_v37 }
  0x9d   :  { %v90_v45 = vadd.f32 %v2192_v30, %v89_v41 }
  0x9e   :  { %v118_v47 = vsel %vm117_vm6, %v2190_v29, %v114_v43  ;;  %v460_v29 = vsel %vm458_vm1, %v451_v21, 0  ;;  %vm427_vm6 = vcmask 1043456  }
  0x9f   :  { %v123_v50 = vsel %vm120_vm8, %v122_v44, %v118_v47  ;;  %v94_v51 = vsel %vm93_vm9, %v2192_v30, %v90_v45  ;;  %v2460_v36 = vand.u32 4294901760, %v460_v29  ;;  %vm437_vm8 = vcmask 1045504  }
  0xa0   :  { %v124_v52 = vmul.f32 %v123_v50, %v104_v46  ;;  %v99_v53 = vsel %vm96_vm10, %v98_v48, %v94_v51  ;;  %vm442_vm9 = vcmask 1046528   ;;  %vm324_vm10 = vcmp.lt.s32.totalorder %v2398_v2, 111 }
  0xa1   :  { %v100_v54 = vmul.f32 %v99_v53, %v80_v49  ;;  %v2484_v48 = vsub.f32 %v460_v29, %v2460_v36 }
  0xa2   :  { %v2313_v55 = vperm.slane %v124_v52, 1  ;;  %v2349_v58 = vperm.slane %v124_v52, 0 }
  0xa3   :  { %v2315_v56 = vperm.slane %v100_v54, 0  ;;  %v2323_v57 = vperm.slane %v100_v54, 1  ;;  %v2492_v54 = vld [vmem:[%s3139_s2 + $0x8] sm:$0xff] }
  0xa4   :  { %197 = vrot.lane.b32.xlu1 %v2313_v55, %s2228_s0  ;;  %v180_v21 = vrot.slane %v2492_v54, 1 }
  0xa5   :  { %191 = vrot.lane.b32.xlu0 %v2315_v56, %s2228_s0  ;;  %162 = vrot.lane.b32.xlu2 %v2315_v56, %s2229_s1  ;;  %v369_v39 = vrot.slane %v2315_v56, 4 }
  0xac   :  { %243 = vrot.lane.b32.xlu1 %v2323_v57, %s2230_s3 }
  0xad   :  { %222 = vrot.lane.b32.xlu0 %v2313_v55, %s2231_s11  ;;  %168 = vrot.lane.b32.xlu2 %v2313_v55, %s2229_s1 }
  0xb4   :  { %291 = vrot.lane.b32.xlu1 %v2315_v56, %s2232_s12 }
  0xb5   :  { %266 = vrot.lane.b32.xlu0 %v2315_v56, %s2233_s13  ;;  %143 = vrot.lane.b32.xlu2 %v2315_v56, %s2234_s14 }
  0xbc   :  { %318 = vrot.lane.b32.xlu1 %v2323_v57, %s2235_s15 }
  0xbd   :  { %293 = vrot.lane.b32.xlu0 %v2323_v57, %s2232_s12  ;;  %149 = vrot.lane.b32.xlu2 %v2313_v55, %s2234_s14 }
  0xc4   :  { %145 = vrot.lane.b32.xlu1 %v2323_v57, %s2234_s14 }
  0xc5   :  { %164 = vrot.lane.b32.xlu0 %v2323_v57, %s2229_s1  ;;  %216 = vrot.lane.b32.xlu2 %v2315_v56, %s2231_s11 }
  0xcc   :  { %270 = vrot.lane.b32.xlu1 %v2349_v58, %s2233_s13 }
  0xcd   :  { %218 = vrot.lane.b32.xlu0 %v2323_v57, %s2231_s11  ;;  %241 = vrot.lane.b32.xlu2 %v2315_v56, %s2230_s3 }
  0xd4   :  { %166 = vrot.lane.b32.xlu1 %v2349_v58, %s2229_s1 }
  0xd5   :  { %295 = vrot.lane.b32.xlu0 %v2349_v58, %s2232_s12  ;;  %268 = vrot.lane.b32.xlu2 %v2323_v57, %s2233_s13 }
  0xdc   :  { %220 = vrot.lane.b32.xlu1 %v2349_v58, %s2231_s11 }
  0xdd   :  { %195 = vrot.lane.b32.xlu0 %v2349_v58, %s2228_s0  ;;  %316 = vrot.lane.b32.xlu2 %v2315_v56, %s2235_s15  ;;  %v2496_v56 = vand.u32 4294901760, %v2484_v48 }
  0xe4   :  { %297 = vrot.lane.b32.xlu1 %v2313_v55, %s2232_s12 }
  0xe5   :  { %247 = vrot.lane.b32.xlu0 %v2313_v55, %s2230_s3  ;;  %193 = vrot.lane.b32.xlu2 %v2323_v57, %s2228_s0 }
  0xed   :  { %322 = vrot.lane.b32.xlu0 %v2313_v55, %s2235_s15  ;;  %245 = vrot.lane.b32.xlu2 %v2349_v58, %s2230_s3 }
  0xf5   :  { %320 = vrot.lane.b32.xlu2 %v2349_v58, %s2235_s15 }
  0xfd   :  { %147 = vrot.lane.b32.xlu2 %v2349_v58, %s2234_s14 }
  0xff   :  { %v2383_v59 = vpop.permute.xlu2 %162 }
 0x105   :  { %272 = vrot.lane.b32.xlu2 %v2313_v55, %s2233_s13 }
 0x107   :  { %v2387_v60 = vpop.permute.xlu2 %168 }
 0x108   :  { %v174_v8 = vsel %vm170_vm11, %v2387_v60, %v2383_v59 }
 0x109   :  { %v187_v14 = vmul.f32 %v179_v7, %v174_v8 }
 0x10b   :  { %v337_v28 = vrot.slane %v187_v14, 7 }
 0x10f   :  { %v2389_v61 = vpop.permute.xlu2 %143 }
 0x116   :  { %v2391_v62 = vpop.permute.xlu1 %197 }
 0x117   :  { %v2393_v63 = vpop.permute.xlu0 %191  ;;  %v2395_v0 = vpop.permute.xlu2 %149 }
 0x118   :  { %v203_v10 = vsel %vm199_vm12, %v2391_v62, %v2393_v63  ;;  %v157_v12 = vsel %vm153_vm13, %v2395_v0, %v2389_v61 }
 0x119   :  { %v212_v16 = vmul.f32 %v204_v9, %v203_v10  ;;  %v158_v22 = vmul.f32 %v157_v12, %v2405_v4  ;;  %v139_v10 = vld [vmem:[%s3139_s2 + $0x20] sm:$0x1] }
 0x11b   :  { %v349_v30 = vrot.slane %v212_v16, 6  ;;  %v413_v31 = vsel %vm49_vm0, %v158_v22, %v337_v28  ;;  %v483_v28 = vsub.f32 %v2484_v48, %v2496_v56 }
 0x11d   :  { %v418_v38 = vsel %vm417_vm2, %v413_v31, %v349_v30 }
 0x11e   :  { %v2400_v3 = vpop.permute.xlu1 %243 }
 0x11f   :  { %v2407_v5 = vpop.permute.xlu0 %222  ;;  %v2409_v6 = vpop.permute.xlu2 %216 }
 0x120   :  { %v228_v13 = vsel %vm224_vm14, %v2407_v5, %v2409_v6 }
 0x121   :  { %v237_v25 = vmul.f32 %v3149_v11, %v228_v13 }
 0x123   :  { %v361_v32 = vrot.slane %v237_v25, 5 }
 0x125   :  { %v423_v42 = vsel %vm422_vm3, %v418_v38, %v361_v32  ;;  %v205_v38 = vrot.slane %v2492_v54, 2 }
 0x126   :  { %v2436_v15 = vpop.permute.xlu1 %291  ;;  %v428_v49 = vsel %vm427_vm6, %v423_v42, %v369_v39  ;;  %v2527_v39 = vand.u32 4294901760, %v483_v28  ;;  %v370_v28 = vrot.slane %v2323_v57, 4 }
 0x127   :  { %v2441_v17 = vpop.permute.xlu0 %266  ;;  %v2443_v18 = vpop.permute.xlu2 %241 }
 0x128   :  { %v252_v27 = vsel %vm249_vm15, %v2443_v18, %v2400_v3 }
 0x129   :  { %v262_v33 = vmul.f32 %v254_v26, %v252_v27 }
 0x12b   :  { %v381_v43 = vrot.slane %v262_v33, 3  ;;  %v230_v33 = vrot.slane %v2492_v54, 3 }
 0x12d   :  { %v433_v52 = vsel %vm432_vm7, %v428_v49, %v381_v43 }
 0x12e   :  { %v2462_v37 = vpop.permute.xlu1 %318 }
 0x12f   :  { %v2466_v40 = vpop.permute.xlu0 %293  ;;  %v2468_v41 = vpop.permute.xlu2 %268 }
 0x130   :  { %v302_v44 = vsel %vm299_vm4, %v2436_v15, %v2466_v40  ;;  %v277_v45 = vsel %vm274_vm5, %v2441_v17, %v2468_v41 }
 0x131   :  { %v312_v46 = vmul.f32 %v3148_v34, %v302_v44  ;;  %v287_v47 = vmul.f32 %v3151_v35, %v277_v45 }
 0x133   :  { %v405_v50 = vrot.slane %v312_v46, 1  ;;  %v393_v51 = vrot.slane %v287_v47, 2 }
 0x135   :  { %v438_v53 = vsel %vm437_vm8, %v433_v52, %v393_v51 }
 0x136   :  { %v2498_v8 = vpop.permute.xlu1 %145  ;;  %v443_v12 = vsel %vm442_vm9, %v438_v53, %v405_v50 }
 0x137   :  { %v2504_v13 = vpop.permute.xlu0 %164  ;;  %v2506_v14 = vpop.permute.xlu2 %316  ;;  %v2508_v16 = vand.u32 4294901760, %v443_v12  ;;  %v156_v44 = vsel %vm153_vm13, %v2389_v61, %v2498_v8 }
 0x138   :  { %v327_v22 = vsel %vm324_vm10, %v2506_v14, %v2462_v37  ;;  %v173_v25 = vsel %vm170_vm11, %v2383_v59, %v2504_v13 }
 0x139   :  { %v329_v27 = vmul.f32 %v327_v22, %v139_v10  ;;  %v510_v29 = vsub.f32 %v443_v12, %v2508_v16  ;;  %v188_v31 = vmul.f32 %v180_v21, %v173_v25  ;;  %v3147_v25 = vrot.slane %v2492_v54, 6 }
 0x13b   :  { %v447_v30 = vsel %vm49_vm0, %v329_v27, 0.0  ;;  %v511_v43 = vand.u32 4294901760, %v510_v29  ;;  %v338_v47 = vrot.slane %v188_v31, 7  ;;  %v3146_v31 = vrot.slane %v2492_v54, 7 }
 0x13c   :  { %v476_v32 = vand.u32 4294901760, %v447_v30 }
 0x13e   :  { %477 = vmatpush.msra.mxu0 %v476_v32  ;;  %561 = vmatpush.msra.mxu3 %v476_v32  ;;  %v2529_v59 = vpop.permute.xlu1 %270  ;;  %v504_v42 = vsub.f32 %v447_v30, %v476_v32 }
 0x13f   :  { %v2535_v45 = vpop.permute.xlu0 %218  ;;  %v2537_v46 = vpop.permute.xlu2 %193  ;;  %v276_v30 = vsel %vm274_vm5, %v2468_v41, %v2529_v59 }
 0x140   :  { %v227_v49 = vsel %vm224_vm14, %v2409_v6, %v2535_v45  ;;  %v202_v50 = vsel %vm199_vm12, %v2393_v63, %v2537_v46  ;;  %479 = vmatpush.msra.mxu0 %v2508_v16  ;;  %536 = vmatpush.msra.mxu2 %v504_v42  ;;  %v505_v51 = vand.u32 4294901760, %v504_v42  ;;  %v159_v6 = vmul.f32 %v156_v44, %v2492_v54 }
 0x141   :  { %v238_v61 = vmul.f32 %v230_v33, %v227_v49  ;;  %v213_v52 = vmul.f32 %v205_v38, %v202_v50  ;;  %563 = vmatpush.msra.mxu3 %v2508_v16  ;;  %485 = vmatmul.f32.vlgmr.msra.gmra.mxu0 %v2527_v39  ;;  %v512_v63 = vsub.f32 %v510_v29, %v511_v43 }
 0x142   :  { %539 = vmatpush.msra.mxu2 %v510_v29  ;;  %588 = vmatpush.msrb.mxu0 %v505_v51  ;;  %v506_v53 = vsub.f32 %v504_v42, %v505_v51  ;;  %v414_v22 = vsel %vm49_vm0, %v159_v6, %v338_v47  ;;  %v3150_v42 = vrot.slane %v2492_v54, 5  ;;  %v288_v41 = vmul.f32 %v3147_v25, %v276_v30  ;;  %v140_v30 = vld [vmem:[%s3139_s2 + $0x28] sm:$0x1] }
 0x143   :  { %v362_v10 = vrot.slane %v238_v61, 5  ;;  %v350_v12 = vrot.slane %v213_v52, 6  ;;  %542 = vmatmul.f32.vlgmr.msra.gmra.mxu2 %v2484_v48  ;;  %567 = vmatmul.f32.vlgmr.msra.gmra.mxu3 %v2496_v56  ;;  %v513_v49 = vand.u32 4294901760, %v512_v63 }
 0x144   :  { %592 = vmatpush.msrb.mxu0 %v511_v43  ;;  %v507_v27 = vand.u32 4294901760, %v506_v53  ;;  %v2236_v53 = vmov 0   ;;  %v394_v63 = vrot.slane %v288_v41, 2 }
 0x145   :  { %v419_v29 = vsel %vm417_vm2, %v414_v22, %v350_v12  ;;  %2187 = vset.pattern.permute.xlu2 %v2236_v53  ;;  %2188 = vset.pattern.permute.xlu0 %v2236_v53 }
 0x146   :  { %v424_v44 = vsel %vm422_vm3, %v419_v29, %v362_v10  ;;  %508 = vmatpush.msra.mxu1 %v507_v27  ;;  %v167_v47 = vpop.permute.xlu1 %166  ;;  %v2596_v10 = vld [vmem:[%s3139_s2 + $0x10] sm:$0xff] }
 0x147   :  { %v2568_v43 = vpop.permute.xlu0 %295  ;;  %v429_v57 = vsel %vm427_vm6, %v424_v44, %v370_v28  ;;  %v2571_v50 = vpop.permute.xlu2 %245 }
 0x148   :  { %v301_v51 = vsel %vm299_vm4, %v2466_v40, %v2568_v43  ;;  %v251_v61 = vsel %vm249_vm15, %v2400_v3, %v2571_v50  ;;  %514 = vmatpush.msra.mxu1 %v513_v49  ;;  %v452_v3 = vld [vmem:[%s3141_s4] sm:$0xff]  ;;  %v181_v49 = vrot.slane %v2596_v10, 1 }
 0x149   :  { %v313_v52 = vmul.f32 %v3146_v31, %v301_v51  ;;  %v263_v6 = vmul.f32 %v3150_v42, %v251_v61  ;;  %516 = vmatmul.f32.vlgmr.msra.gmra.mxu1 %v2460_v36  ;;  %594 = vmatmul.f32.vlgmr.msrb.gmra.mxu0 %v2460_v36  ;;  %v231_v51 = vrot.slane %v2596_v10, 3  ;;  %v172_v61 = vsel %vm170_vm11, %v2504_v13, %v167_v47 }
 0x14a   :  { %613 = vmatpush.msrb.mxu1 %v476_v32  ;;  %v2601_v32 = vld [vmem:[%s3139_s2 + $0x18] sm:$0xff]  ;;  %455 = vperm.xlu2 %2187, %v452_v3  }
 0x14b   :  { %v382_v40 = vrot.slane %v263_v6, 3  ;;  %v406_v12 = vrot.slane %v313_v52, 1  ;;  %v182_v41 = vrot.slane %v2601_v32, 1 }
 0x14c   :  { %615 = vmatpush.msrb.mxu1 %v2508_v16 }
 0x14d   :  { %v434_v22 = vsel %vm432_vm7, %v429_v57, %v382_v40  ;;  %v171_v57 = vsel %vm170_vm11, %v167_v47, %v2387_v60  ;;  %v206_v40 = vrot.slane %v2596_v10, 2  ;;  %v3152_v60 = vrot.slane %v2601_v32, 2 }
 0x14e   :  { %v439_v16 = vsel %vm437_vm8, %v434_v22, %v394_v63  ;;  %v221_v27 = vpop.permute.xlu1 %220  ;;  %v189_v47 = vmul.f32 %v181_v49, %v172_v61  ;;  %v190_v3 = vmul.f32 %v182_v41, %v171_v57  ;;  %v232_v22 = vrot.slane %v2601_v32, 3 }
 0x14f   :  { %v196_v28 = vpop.permute.xlu0 %195  ;;  %v2608_v29 = vpop.permute.xlu2 %320  ;;  %v444_v44 = vsel %vm442_vm9, %v439_v16, %v406_v12  ;;  %v226_v53 = vsel %vm224_vm14, %v2535_v45, %v221_v27 }
 0x150   :  { %v326_v52 = vsel %vm324_vm10, %v2462_v37, %v2608_v29  ;;  %v2625_v6 = vand.u32 4294901760, %v444_v44  ;;  %v200_v13 = vsel %vm199_vm12, %v196_v28, %v2391_v62  ;;  %v201_v37 = vsel %vm199_vm12, %v2537_v46, %v196_v28 }
 0x151   :  { %617 = vmatmul.f32.vlgmr.msrb.gmra.mxu1 %v2460_v36  ;;  %v330_v63 = vmul.f32 %v326_v52, %v140_v30  ;;  %v239_v16 = vmul.f32 %v231_v51, %v226_v53  ;;  %v371_v30 = vrot.slane %v2349_v58, 4  ;;  %v225_v46 = vsel %vm224_vm14, %v221_v27, %v2407_v5 }
 0x152   :  { %v669_v12 = vsub.f32 %v444_v44, %v2625_v6  ;;  %v214_v28 = vmul.f32 %v206_v40, %v201_v37  ;;  %v215_v57 = vmul.f32 %v3152_v60, %v200_v13  ;;  %v372_v44 = vrot.slane %v2313_v55, 4 }
 0x153   :  { %v448_v45 = vsel %vm49_vm0, %v330_v63, 0.0  ;;  %v306_v52 = vrot.slane %v2596_v10, 7  ;;  %v307_v53 = vrot.slane %v2601_v32, 7  ;;  %v256_v5 = vrot.slane %v2596_v10, 5 }
 0x154   :  { %v2647_v62 = vand.u32 4294901760, %v448_v45  ;;  %v339_v37 = vrot.slane %v189_v47, 7  ;;  %v340_v1 = vrot.slane %v190_v3, 7  ;;  %v257_v13 = vrot.slane %v2601_v32, 5 }
 0x155   :  { %v670_v25 = vand.u32 4294901760, %v669_v12  ;;  %v363_v34 = vrot.slane %v239_v16, 5  ;;  %v351_v47 = vrot.slane %v214_v28, 6  ;;  %v352_v3 = vrot.slane %v215_v57, 6 }
 0x156   :  { %v663_v61 = vsub.f32 %v448_v45, %v2647_v62  ;;  %636 = vmatpush.msrb.mxu2 %v2647_v62  ;;  %720 = vmatpush.msra.mxu1 %v2647_v62  ;;  %v298_v31 = vpop.permute.xlu1 %297  ;;  %v240_v45 = vmul.f32 %v232_v22, %v225_v46 }
 0x157   :  { %v248_v27 = vpop.permute.xlu0 %247  ;;  %v148_v63 = vpop.permute.xlu2 %147  ;;  %v300_v16 = vsel %vm299_vm4, %v2568_v43, %v298_v31  ;;  %v671_v28 = vsub.f32 %v669_v12, %v670_v25 }
 0x158   :  { %v154_v11 = vsel %vm153_vm13, %v148_v63, %v2395_v0  ;;  %v155_v42 = vsel %vm153_vm13, %v2498_v8, %v148_v63  ;;  %638 = vmatpush.msrb.mxu2 %v2625_v6  ;;  %695 = vmatpush.msra.mxu0 %v663_v61  ;;  %v303_v0 = vsel %vm299_vm4, %v298_v31, %v2436_v15  ;;  %v364_v15 = vrot.slane %v240_v45, 5 }
 0x159   :  { %v160_v35 = vmul.f32 %v155_v42, %v2596_v10  ;;  %v161_v60 = vmul.f32 %v154_v11, %v2601_v32  ;;  %722 = vmatpush.msra.mxu1 %v2625_v6  ;;  %v250_v8 = vsel %vm249_vm15, %v2571_v50, %v248_v27  ;;  %644 = vmatmul.f32.vlgmr.msrb.gmra.mxu2 %v2527_v39  ;;  %v664_v42 = vand.u32 4294901760, %v663_v61 }
 0x15a   :  { %726 = vmatmul.f32.vlgmr.msra.gmra.mxu1 %v2496_v56  ;;  %v253_v11 = vsel %vm249_vm15, %v248_v27, %v2443_v18  ;;  %698 = vmatpush.msra.mxu0 %v669_v12  ;;  %v314_v63 = vmul.f32 %v306_v52, %v300_v16  ;;  %v264_v18 = vmul.f32 %v256_v5, %v250_v8  ;;  %v282_v12 = vrot.slane %v2601_v32, 6 }
 0x15b   :  { %v415_v46 = vsel %vm49_vm0, %v160_v35, %v339_v37  ;;  %v416_v43 = vsel %vm49_vm0, %v161_v60, %v340_v1  ;;  %747 = vmatpush.msra.mxu2 %v664_v42  ;;  %v665_v57 = vsub.f32 %v663_v61, %v664_v42  ;;  %701 = vmatmul.f32.vlgmr.msra.gmra.mxu0 %v2484_v48  ;;  %v141_v1 = vld [vmem:[%s3139_s2 + $0x30] sm:$0x1]  ;;  %v142_v35 = vld [vmem:[%s3139_s2 + $0x38] sm:$0x1]  ;;  %v281_v60 = vrot.slane %v2596_v10, 6 }
 0x15c   :  { %v420_v31 = vsel %vm417_vm2, %v415_v46, %v351_v47  ;;  %v421_v50 = vsel %vm417_vm2, %v416_v43, %v352_v3  ;;  %v265_v61 = vmul.f32 %v257_v13, %v253_v11  ;;  %v315_v16 = vmul.f32 %v307_v53, %v303_v0 }
 0x15d   :  { %v425_v27 = vsel %vm422_vm3, %v420_v31, %v363_v34  ;;  %v426_v37 = vsel %vm422_vm3, %v421_v50, %v364_v15  ;;  %751 = vmatpush.msra.mxu2 %v670_v25  ;;  %v666_v45 = vand.u32 4294901760, %v665_v57  ;;  %v672_v11 = vand.u32 4294901760, %v671_v28 }
 0x15e   :  { %v383_v15 = vrot.slane %v264_v18, 3  ;;  %v408_v57 = vrot.slane %v315_v16, 1  ;;  %v2140_v10 = vrot.slane %v2305_v24, 4 }
 0x15f   :  { %v323_v47 = vpop.permute.xlu0 %322  ;;  %v273_v3 = vpop.permute.xlu2 %272  ;;  %667 = vmatpush.msrb.mxu3 %v666_v45 }
 0x160   :  { %v325_v8 = vsel %vm324_vm10, %v2608_v29, %v323_v47  ;;  %v328_v42 = vsel %vm324_vm10, %v323_v47, %v2506_v14  ;;  %v275_v25 = vsel %vm274_vm5, %v2529_v59, %v273_v3  ;;  %v278_v0 = vsel %vm274_vm5, %v273_v3, %v2441_v17 }
 0x161   :  { %v331_v34 = vmul.f32 %v325_v8, %v141_v1  ;;  %v332_v46 = vmul.f32 %v328_v42, %v142_v35  ;;  %v430_v29 = vsel %vm427_vm6, %v425_v27, %v371_v30  ;;  %v431_v14 = vsel %vm427_vm6, %v426_v37, %v372_v44  ;;  %673 = vmatpush.msrb.mxu3 %v672_v11 }
 0x162   :  { %v289_v43 = vmul.f32 %v281_v60, %v275_v25  ;;  %v290_v28 = vmul.f32 %v282_v12, %v278_v0  ;;  %v384_v59 = vrot.slane %v265_v61, 3  ;;  %753 = vmatmul.f32.vlgmr.msra.gmra.mxu2 %v2460_v36  ;;  %675 = vmatmul.f32.vlgmr.msrb.gmra.mxu3 %v2460_v36  ;;  %v407_v44 = vrot.slane %v314_v63, 1 }
 0x163   :  { %v449_v31 = vsel %vm49_vm0, %v331_v34, 0.0  ;;  %v450_v17 = vsel %vm49_vm0, %v332_v46, 0.0  ;;  %v435_v1 = vsel %vm432_vm7, %v430_v29, %v383_v15  ;;  %772 = vmatpush.msra.mxu3 %v2647_v62  ;;  %vm1104_vm0 = vcmask 64512  }
 0x164   :  { %v794_v58 = vand.u32 4294901760, %v449_v31  ;;  %v953_v30 = vand.u32 4294901760, %v450_v17  ;;  %v395_v55 = vrot.slane %v289_v43, 2  ;;  %v396_v50 = vrot.slane %v290_v28, 2 }
 0x165   :  { %v436_v18 = vsel %vm432_vm7, %v431_v14, %v384_v59  ;;  %774 = vmatpush.msra.mxu3 %v2625_v6 }
 0x166   :  { %v822_v35 = vsub.f32 %v449_v31, %v794_v58  ;;  %v981_v61 = vsub.f32 %v450_v17, %v953_v30  ;;  %v440_v27 = vsel %vm437_vm8, %v435_v1, %v395_v55  ;;  %v441_v37 = vsel %vm437_vm8, %v436_v18, %v396_v50  ;;  %795 = vmatpush.msrb.mxu0 %v794_v58 }
 0x167   :  { %v445_v45 = vsel %vm442_vm9, %v440_v27, %v407_v44  ;;  %v446_v63 = vsel %vm442_vm9, %v441_v37, %v408_v57  ;;  %879 = vmatpush.msrb.mxu3 %v794_v58 }
 0x168   :  { %854 = vmatpush.msrb.mxu2 %v822_v35  ;;  %v796_v47 = vand.u32 4294901760, %v445_v45  ;;  %v823_v3 = vand.u32 4294901760, %v822_v35  ;;  %v955_v16 = vand.u32 4294901760, %v446_v63  ;;  %v982_v8 = vand.u32 4294901760, %v981_v61 }
 0x16a   :  { %797 = vmatpush.msrb.mxu0 %v796_v47  ;;  %881 = vmatpush.msrb.mxu3 %v796_v47  ;;  %v828_v62 = vsub.f32 %v445_v45, %v796_v47  ;;  %v824_v42 = vsub.f32 %v822_v35, %v823_v3  ;;  %v983_v11 = vsub.f32 %v981_v61, %v982_v8 }
 0x16b   :  { %803 = vmatmul.f32.vlgmr.msrb.gmra.mxu0 %v2527_v39  ;;  %v987_v34 = vsub.f32 %v446_v63, %v955_v16  ;;  %776 = vmatmul.f32.vlgmr.msra.gmra.mxu3 %v2460_v36 }
 0x16c   :  { %906 = vmatpush.msra.mxu0 %v823_v3  ;;  %v829_v6 = vand.u32 4294901760, %v828_v62  ;;  %v825_v46 = vand.u32 4294901760, %v824_v42  ;;  %v984_v25 = vand.u32 4294901760, %v983_v11  ;;  %857 = vmatpush.msrb.mxu2 %v828_v62 }
 0x16d   :  { %v988_v0 = vand.u32 4294901760, %v987_v34  ;;  %860 = vmatmul.f32.vlgmr.msrb.gmra.mxu2 %v2484_v48 }
 0x16e   :  { %910 = vmatpush.msra.mxu0 %v829_v6  ;;  %v830_v29 = vsub.f32 %v828_v62, %v829_v6  ;;  %954 = vmatpush.msra.mxu2 %v953_v30 }
 0x16f   :  { %826 = vmatpush.msrb.mxu1 %v825_v46  ;;  %v989_v14 = vsub.f32 %v987_v34, %v988_v0  ;;  %985 = vmatpush.msra.mxu3 %v984_v25 }
 0x170   :  { %1013 = vmatpush.msrb.mxu0 %v981_v61  ;;  %v831_v43 = vand.u32 4294901760, %v830_v29  ;;  %956 = vmatpush.msra.mxu2 %v955_v16 }
 0x171   :  { %v990_v28 = vand.u32 4294901760, %v989_v14 }
 0x172   :  { %1065 = vmatpush.msrb.mxu2 %v982_v8  ;;  %1016 = vmatpush.msrb.mxu0 %v987_v34 }
 0x173   :  { %832 = vmatpush.msrb.mxu1 %v831_v43  ;;  %991 = vmatpush.msra.mxu3 %v990_v28 }
 0x174   :  { %885 = vmatmul.f32.vlgmr.msrb.gmra.mxu3 %v2496_v56  ;;  %1069 = vmatpush.msrb.mxu2 %v988_v0 }
 0x175   :  { %834 = vmatmul.f32.vlgmr.msrb.gmra.mxu1 %v2460_v36  ;;  %1090 = vmatpush.msrb.mxu3 %v953_v30 }
 0x176   :  { %931 = vmatpush.msra.mxu1 %v794_v58  ;;  %962 = vmatmul.f32.vlgmr.msra.gmra.mxu2 %v2527_v39  ;;  %v1102_v39 = vld [vmem:[%s3142_s5] sm:$0xff] }
 0x177   :  { %1092 = vmatpush.msrb.mxu3 %v955_v16  ;;  %912 = vmatmul.f32.vlgmr.msra.gmra.mxu0 %v2460_v36  ;;  %v1106_v15 = vsel %vm1104_vm0, %v1102_v39, 0 }
 0x178   :  { %933 = vmatpush.msra.mxu1 %v796_v47  ;;  %v2766_v17 = vand.u32 4294901760, %v1106_v15 }
 0x17a   :  { %1038 = vmatpush.msrb.mxu1 %v953_v30 }
 0x17c   :  { %1040 = vmatpush.msrb.mxu1 %v955_v16  ;;  %993 = vmatmul.f32.vlgmr.msra.gmra.mxu3 %v2460_v36 }
 0x17d   :  { %935 = vmatmul.f32.vlgmr.msra.gmra.mxu1 %v2460_v36 }
 0x17e   :  { %1071 = vmatmul.f32.vlgmr.msrb.gmra.mxu2 %v2460_v36 }
 0x17f   :  { %1019 = vmatmul.f32.vlgmr.msrb.gmra.mxu0 %v2484_v48  ;;  %v1103_v48 = vld [vmem:[%s3142_s5 + $0x8] sm:$0x1] }
 0x180   :  { %v1109_v50 = vsel %vm1104_vm0, %v1103_v48, 0 }
 0x181   :  { %v2778_v35 = vand.u32 4294901760, %v1109_v50 }
 0x183   :  { %v2783_v63 = vsub.f32 %v1109_v50, %v2778_v35 }
 0x184   :  { %1094 = vmatmul.f32.vlgmr.msrb.gmra.mxu3 %v2460_v36 }
 0x185   :  { %1044 = vmatmul.f32.vlgmr.msrb.gmra.mxu1 %v2496_v56  ;;  %v2773_v56 = vsub.f32 %v1106_v15, %v2766_v17  ;;  %v2788_v8 = vand.u32 4294901760, %v2783_v63 }
 0x187   :  { %v2776_v18 = vand.u32 4294901760, %v2773_v56  ;;  %v1139_v11 = vsub.f32 %v2783_v63, %v2788_v8 }
 0x189   :  { %v1131_v45 = vsub.f32 %v2773_v56, %v2776_v18  ;;  %v2795_v46 = vand.u32 4294901760, %v1139_v11 }
 0x18b   :  { %v2785_v16 = vand.u32 4294901760, %v1131_v45 }
 0x1a4   :  { %v2764_v59 = vpop.permute.xlu2 %455 }
 0x1be   :  { %v486_v31 = vpop.f32.mrf.mxu0 }
 0x1bf   :  { %v487_v58 = vadd.f32 %v486_v31, %v2764_v59 }
 0x1c6   :  { %v517_v36 = vpop.f32.mrf.mxu1  ;;  %v543_v30 = vpop.f32.mrf.mxu2 }
 0x1c7   :  { %v518_v55 = vadd.f32 %v517_v36, %v487_v58  ;;  %v568_v44 = vpop.f32.mrf.mxu3  ;;  %v595_v1 = vpop.f32.mrf.mxu0 }
 0x1c9   :  { %v544_v57 = vadd.f32 %v543_v30, %v518_v55 }
 0x1cb   :  { %v569_v61 = vadd.f32 %v568_v44, %v544_v57 }
 0x1cd   :  { %v596_v27 = vadd.f32 %v595_v1, %v569_v61 }
 0x1ce   :  { %v618_v37 = vpop.f32.mrf.mxu1 }
 0x1cf   :  { %v619_v47 = vadd.f32 %v618_v37, %v596_v27 }
 0x1d1   :  { %v1098_v3 = vmax.f32 %v619_v47, 0.0 }
 0x1d3   :  { %v1126_v62 = vand.u32 4294901760, %v1098_v3 }
 0x1d5   :  { %v1161_v42 = vsub.f32 %v1098_v3, %v1126_v62  ;;  %1127 = vmatpush.msra.mxu0 %v1126_v62  ;;  %1220 = vmatpush.msra.mxu3 %v1126_v62 }
 0x1d6   :  { %1133 = vmatmul.f32.vlgmr.msra.gmra.mxu0 %v2785_v16  ;;  %1224 = vmatmul.f32.vlgmr.msra.gmra.mxu3 %v2776_v18 }
 0x1d7   :  { %v1162_v34 = vand.u32 4294901760, %v1161_v42  ;;  %1192 = vmatpush.msra.mxu2 %v1161_v42  ;;  %v727_v15 = vpop.f32.mrf.mxu1 }
 0x1d8   :  { %1195 = vmatmul.f32.vlgmr.msra.gmra.mxu2 %v2773_v56  ;;  %v702_v29 = vpop.f32.mrf.mxu0 }
 0x1d9   :  { %v1163_v6 = vsub.f32 %v1161_v42, %v1162_v34  ;;  %1252 = vmatpush.msrb.mxu0 %v1162_v34 }
 0x1db   :  { %v1164_v25 = vand.u32 4294901760, %v1163_v6 }
 0x1dc   :  { %v645_v0 = vpop.f32.mrf.mxu2 }
 0x1dd   :  { %1165 = vmatpush.msra.mxu1 %v1164_v25  ;;  %v646_v14 = vadd.f32 %v645_v0, %v2764_v59 }
 0x1de   :  { %1167 = vmatmul.f32.vlgmr.msra.gmra.mxu1 %v2766_v17  ;;  %1141 = vmatmul.f32.gmra.mxu0 %v2795_v46 }
 0x1df   :  { %1278 = vmatpush.msrb.mxu1 %v1126_v62  ;;  %1230 = vmatmul.f32.gmra.mxu3 %v2788_v8 }
 0x1e0   :  { %1200 = vmatmul.f32.gmra.mxu2 %v2783_v63 }
 0x1e5   :  { %v676_v43 = vpop.f32.mrf.mxu3  ;;  %v754_v28 = vpop.f32.mrf.mxu2 }
 0x1e6   :  { %1171 = vmatmul.f32.gmra.mxu1 %v2778_v35  ;;  %1254 = vmatmul.f32.vlgmr.msrb.gmra.mxu0 %v2766_v17  ;;  %v677_v39 = vadd.f32 %v676_v43, %v646_v14 }
 0x1e8   :  { %v703_v31 = vadd.f32 %v702_v29, %v677_v39  ;;  %v804_v48 = vpop.f32.mrf.mxu0 }
 0x1e9   :  { %v805_v50 = vadd.f32 %v804_v48, %v2764_v59 }
 0x1ea   :  { %v728_v58 = vadd.f32 %v727_v15, %v703_v31 }
 0x1ec   :  { %v755_v36 = vadd.f32 %v754_v28, %v728_v58 }
 0x1ee   :  { %1280 = vmatmul.f32.vlgmr.msrb.gmra.mxu1 %v2766_v17  ;;  %1258 = vmatmul.f32.gmra.mxu0 %v2778_v35  ;;  %v777_v30 = vpop.f32.mrf.mxu3 }
 0x1ef   :  { %v778_v55 = vadd.f32 %v777_v30, %v755_v36 }
 0x1f0   :  { %v861_v44 = vpop.f32.mrf.mxu2 }
 0x1f1   :  { %v1099_v57 = vmax.f32 %v778_v55, 0.0 }
 0x1f2   :  { %v835_v1 = vpop.f32.mrf.mxu1 }
 0x1f3   :  { %v836_v61 = vadd.f32 %v835_v1, %v805_v50  ;;  %v1303_v27 = vand.u32 4294901760, %v1099_v57 }
 0x1f4   :  { %v913_v45 = vpop.f32.mrf.mxu0 }
 0x1f5   :  { %v862_v37 = vadd.f32 %v861_v44, %v836_v61  ;;  %v1338_v47 = vsub.f32 %v1099_v57, %v1303_v27  ;;  %1304 = vmatpush.msrb.mxu2 %v1303_v27  ;;  %1397 = vmatpush.msra.mxu1 %v1303_v27 }
 0x1f6   :  { %1310 = vmatmul.f32.vlgmr.msrb.gmra.mxu2 %v2785_v16  ;;  %1284 = vmatmul.f32.gmra.mxu1 %v2778_v35 }
 0x1f7   :  { %v886_v3 = vpop.f32.mrf.mxu3  ;;  %v1339_v62 = vand.u32 4294901760, %v1338_v47  ;;  %1369 = vmatpush.msra.mxu0 %v1338_v47 }
 0x1f8   :  { %v887_v42 = vadd.f32 %v886_v3, %v862_v37  ;;  %1372 = vmatmul.f32.vlgmr.msra.gmra.mxu0 %v2773_v56 }
 0x1f9   :  { %v1340_v11 = vsub.f32 %v1338_v47, %v1339_v62  ;;  %1429 = vmatpush.msra.mxu2 %v1339_v62  ;;  %v963_v25 = vpop.f32.mrf.mxu2 }
 0x1fa   :  { %v914_v34 = vadd.f32 %v913_v45, %v887_v42  ;;  %v936_v6 = vpop.f32.mrf.mxu1  ;;  %v964_v14 = vadd.f32 %v963_v25, %v2764_v59 }
 0x1fb   :  { %v1341_v29 = vand.u32 4294901760, %v1340_v11 }
 0x1fc   :  { %v937_v0 = vadd.f32 %v936_v6, %v914_v34  ;;  %v1020_v39 = vpop.f32.mrf.mxu0 }
 0x1fd   :  { %1342 = vmatpush.msrb.mxu3 %v1341_v29 }
 0x1fe   :  { %v1100_v43 = vmax.f32 %v937_v0, 0.0  ;;  %1318 = vmatmul.f32.gmra.mxu2 %v2795_v46  ;;  %1344 = vmatmul.f32.vlgmr.msrb.gmra.mxu3 %v2766_v17 }
 0x1ff   :  { %v994_v28 = vpop.f32.mrf.mxu3  ;;  %1455 = vmatpush.msra.mxu3 %v1303_v27  ;;  %1401 = vmatmul.f32.vlgmr.msra.gmra.mxu1 %v2776_v18 }
 0x200   :  { %v1480_v15 = vand.u32 4294901760, %v1100_v43  ;;  %v995_v31 = vadd.f32 %v994_v28, %v964_v14  ;;  %1377 = vmatmul.f32.gmra.mxu0 %v2783_v63 }
 0x201   :  { %v1072_v36 = vpop.f32.mrf.mxu2 }
 0x202   :  { %v1515_v58 = vsub.f32 %v1100_v43, %v1480_v15  ;;  %v1021_v48 = vadd.f32 %v1020_v39, %v995_v31  ;;  %1481 = vmatpush.msrb.mxu0 %v1480_v15  ;;  %1574 = vmatpush.msrb.mxu3 %v1480_v15  ;;  %v1045_v59 = vpop.f32.mrf.mxu1 }
 0x204   :  { %v1516_v30 = vand.u32 4294901760, %v1515_v58  ;;  %v1046_v55 = vadd.f32 %v1045_v59, %v1021_v48  ;;  %1546 = vmatpush.msrb.mxu2 %v1515_v58 }
 0x206   :  { %v1517_v50 = vsub.f32 %v1515_v58, %v1516_v30  ;;  %v1073_v44 = vadd.f32 %v1072_v36, %v1046_v55  ;;  %1606 = vmatpush.msra.mxu0 %v1516_v30  ;;  %1348 = vmatmul.f32.gmra.mxu3 %v2778_v35 }
 0x207   :  { %v1095_v57 = vpop.f32.mrf.mxu3  ;;  %1431 = vmatmul.f32.vlgmr.msra.gmra.mxu2 %v2766_v17  ;;  %1407 = vmatmul.f32.gmra.mxu1 %v2788_v8 }
 0x208   :  { %v1096_v1 = vadd.f32 %v1095_v57, %v1073_v44  ;;  %v1518_v61 = vand.u32 4294901760, %v1517_v50  ;;  %1487 = vmatmul.f32.vlgmr.msrb.gmra.mxu0 %v2785_v16 }
 0x20a   :  { %v1101_v27 = vmax.f32 %v1096_v1, 0.0  ;;  %1519 = vmatpush.msrb.mxu1 %v1518_v61 }
 0x20c   :  { %1632 = vmatpush.msra.mxu1 %v1480_v15  ;;  %v1657_v37 = vand.u32 4294901760, %v1101_v27 }
 0x20e   :  { %v1692_v45 = vsub.f32 %v1101_v27, %v1657_v37  ;;  %1658 = vmatpush.msra.mxu2 %v1657_v37  ;;  %1457 = vmatmul.f32.vlgmr.msra.gmra.mxu3 %v2766_v17 }
 0x20f   :  { %1435 = vmatmul.f32.gmra.mxu2 %v2778_v35  ;;  %1521 = vmatmul.f32.vlgmr.msrb.gmra.mxu1 %v2766_v17 }
 0x210   :  { %v1693_v47 = vand.u32 4294901760, %v1692_v45  ;;  %1723 = vmatpush.msrb.mxu0 %v1692_v45  ;;  %1751 = vmatpush.msrb.mxu1 %v1657_v37 }
 0x211   :  { %1495 = vmatmul.f32.gmra.mxu0 %v2795_v46 }
 0x212   :  { %v1694_v3 = vsub.f32 %v1692_v45, %v1693_v47 }
 0x214   :  { %v1695_v62 = vand.u32 4294901760, %v1694_v3 }
 0x216   :  { %1696 = vmatpush.msra.mxu3 %v1695_v62 }
 0x217   :  { %1461 = vmatmul.f32.gmra.mxu3 %v2778_v35  ;;  %1549 = vmatmul.f32.vlgmr.msrb.gmra.mxu2 %v2773_v56 }
 0x218   :  { %1783 = vmatpush.msrb.mxu2 %v1693_v47  ;;  %1525 = vmatmul.f32.gmra.mxu1 %v2778_v35 }
 0x219   :  { %1608 = vmatmul.f32.vlgmr.msra.gmra.mxu0 %v2766_v17 }
 0x21f   :  { %1578 = vmatmul.f32.vlgmr.msrb.gmra.mxu3 %v2776_v18  ;;  %1554 = vmatmul.f32.gmra.mxu2 %v2783_v63 }
 0x220   :  { %1809 = vmatpush.msrb.mxu3 %v1657_v37  ;;  %1634 = vmatmul.f32.vlgmr.msra.gmra.mxu1 %v2766_v17 }
 0x221   :  { %1612 = vmatmul.f32.gmra.mxu0 %v2778_v35 }
 0x227   :  { %1584 = vmatmul.f32.gmra.mxu3 %v2788_v8  ;;  %1664 = vmatmul.f32.vlgmr.msra.gmra.mxu2 %v2785_v16 }
 0x228   :  { %1638 = vmatmul.f32.gmra.mxu1 %v2778_v35 }
 0x229   :  { %1726 = vmatmul.f32.vlgmr.msrb.gmra.mxu0 %v2773_v56 }
 0x22f   :  { %1698 = vmatmul.f32.vlgmr.msra.gmra.mxu3 %v2766_v17  ;;  %1672 = vmatmul.f32.gmra.mxu2 %v2795_v46 }
 0x230   :  { %1755 = vmatmul.f32.vlgmr.msrb.gmra.mxu1 %v2776_v18 }
 0x231   :  { %1731 = vmatmul.f32.gmra.mxu0 %v2783_v63 }
 0x237   :  { %1702 = vmatmul.f32.gmra.mxu3 %v2778_v35  ;;  %1785 = vmatmul.f32.vlgmr.msrb.gmra.mxu2 %v2766_v17 }
 0x238   :  { %1761 = vmatmul.f32.gmra.mxu1 %v2788_v8 }
 0x23f   :  { %1811 = vmatmul.f32.vlgmr.msrb.gmra.mxu3 %v2766_v17  ;;  %1789 = vmatmul.f32.gmra.mxu2 %v2778_v35 }
 0x247   :  { %1815 = vmatmul.f32.gmra.mxu3 %v2778_v35 }
 0x253   :  { %v1134_v56 = vpop.f32.mrf.mxu0 }
 0x259   :  { %v1225_v34 = vpop.f32.mrf.mxu3 }
 0x25b   :  { %v1168_v16 = vpop.f32.mrf.mxu1  ;;  %v1142_v42 = vpop.f32.mrf.mxu0 }
 0x25c   :  { %v1169_v46 = vadd.f32 %v1168_v16, %v1134_v56  ;;  %v1196_v11 = vpop.f32.mrf.mxu2 }
 0x25e   :  { %v1197_v18 = vadd.f32 %v1196_v11, %v1169_v46 }
 0x260   :  { %v1226_v6 = vadd.f32 %v1225_v34, %v1197_v18 }
 0x262   :  { %v1231_v31 = vpop.f32.mrf.mxu3 }
 0x263   :  { %v1172_v63 = vpop.f32.mrf.mxu1  ;;  %v1255_v25 = vpop.f32.mrf.mxu0 }
 0x264   :  { %v1256_v0 = vadd.f32 %v1255_v25, %v1226_v6  ;;  %v1173_v8 = vadd.f32 %v1172_v63, %v1142_v42  ;;  %v1201_v43 = vpop.f32.mrf.mxu2 }
 0x266   :  { %v1202_v39 = vadd.f32 %v1201_v43, %v1173_v8 }
 0x268   :  { %v1232_v48 = vadd.f32 %v1231_v31, %v1202_v39 }
 0x26b   :  { %v1281_v29 = vpop.f32.mrf.mxu1  ;;  %v1259_v28 = vpop.f32.mrf.mxu0 }
 0x26c   :  { %v2845_v14 = vadd.f32 %v1281_v29, %v1256_v0  ;;  %v1260_v55 = vadd.f32 %v1259_v28, %v1232_v48 }
 0x26e   :  { %1819 = vrot.lane.b32.xlu1 %v2845_v14, %s2234_s14  ;;  %v1855_v17 = vrot.slane %v2845_v14, 1  ;;  %v1895_v35 = vrot.slane %v2845_v14, 2  ;;  %v1935_v15 = vrot.slane %v2845_v14, 3  ;;  %v1975_v59 = vrot.slane %v2845_v14, 5 }
 0x26f   :  { %v2015_v36 = vrot.slane %v2845_v14, 6  ;;  %v2055_v44 = vrot.slane %v2845_v14, 7 }
 0x270   :  { %1863 = vrot.lane.b32.xlu0 %v1855_v17, %s2229_s1  ;;  %1903 = vrot.lane.b32.xlu2 %v1895_v35, %s2228_s0 }
 0x273   :  { %v1285_v58 = vpop.f32.mrf.mxu1 }
 0x274   :  { %v1286_v1 = vadd.f32 %v1285_v58, %v1260_v55 }
 0x275   :  { %v1373_v30 = vpop.f32.mrf.mxu0 }
 0x276   :  { %1943 = vrot.lane.b32.xlu1 %v1935_v15, %s2231_s11 }
 0x278   :  { %1983 = vrot.lane.b32.xlu0 %v1975_v59, %s2230_s3  ;;  %2023 = vrot.lane.b32.xlu2 %v2015_v36, %s2233_s13 }
 0x279   :  { %v1311_v50 = vpop.f32.mrf.mxu2 }
 0x27c   :  { %v1402_v57 = vpop.f32.mrf.mxu1 }
 0x27d   :  { %v1378_v37 = vpop.f32.mrf.mxu0 }
 0x27e   :  { %2063 = vrot.lane.b32.xlu1 %v2055_v44, %s2232_s12 }
 0x280   :  { %2095 = vrot.lane.b32.xlu0 %v1286_v1, %s2235_s15 }
 0x281   :  { %v1345_v61 = vpop.f32.mrf.mxu3  ;;  %v1319_v27 = vpop.f32.mrf.mxu2 }
 0x282   :  { %v1346_v47 = vadd.f32 %v1345_v61, %v1311_v50 }
 0x284   :  { %v1408_v45 = vpop.f32.mrf.mxu1  ;;  %v1374_v56 = vadd.f32 %v1373_v30, %v1346_v47 }
 0x285   :  { %v1488_v46 = vpop.f32.mrf.mxu0 }
 0x286   :  { %v1403_v11 = vadd.f32 %v1402_v57, %v1374_v56 }
 0x289   :  { %v1349_v3 = vpop.f32.mrf.mxu3 }
 0x28a   :  { %v1432_v62 = vpop.f32.mrf.mxu2  ;;  %v1350_v16 = vadd.f32 %v1349_v3, %v1319_v27 }
 0x28b   :  { %v1433_v63 = vadd.f32 %v1432_v62, %v1403_v11 }
 0x28c   :  { %v1379_v42 = vadd.f32 %v1378_v37, %v1350_v16  ;;  %v1522_v34 = vpop.f32.mrf.mxu1 }
 0x28d   :  { %v1523_v15 = vadd.f32 %v1522_v34, %v1488_v46 }
 0x28e   :  { %v2862_v18 = vadd.f32 %v1408_v45, %v1379_v42  ;;  %v1496_v17 = vpop.f32.mrf.mxu0 }
 0x291   :  { %v1458_v6 = vpop.f32.mrf.mxu3 }
 0x292   :  { %v2864_v25 = vpop.f32.mrf.mxu2  ;;  %v2866_v0 = vadd.f32 %v1458_v6, %v1433_v63 }
 0x294   :  { %1821 = vrot.lane.b32.xlu0 %v2866_v0, %s2234_s14  ;;  %v1896_v29 = vrot.slane %v2866_v0, 2  ;;  %v1856_v8 = vrot.slane %v2866_v0, 1  ;;  %v1936_v39 = vrot.slane %v2866_v0, 3  ;;  %v2016_v31 = vrot.slane %v2866_v0, 6 }
 0x295   :  { %v1526_v35 = vpop.f32.mrf.mxu1  ;;  %v1976_v58 = vrot.slane %v2866_v0, 5  ;;  %v2056_v50 = vrot.slane %v2866_v0, 7 }
 0x296   :  { %1905 = vrot.lane.b32.xlu1 %v1896_v29, %s2228_s0  ;;  %1865 = vrot.lane.b32.xlu2 %v1856_v8, %s2229_s1  ;;  %v1609_v59 = vpop.f32.mrf.mxu0 }
 0x29a   :  { %v2874_v43 = vpop.f32.mrf.mxu3  ;;  %v1550_v28 = vpop.f32.mrf.mxu2 }
 0x29b   :  { %v1551_v48 = vadd.f32 %v1550_v28, %v1523_v15 }
 0x29c   :  { %1945 = vrot.lane.b32.xlu0 %v1936_v39, %s2231_s11 }
 0x29d   :  { %v1635_v44 = vpop.f32.mrf.mxu1 }
 0x29e   :  { %2025 = vrot.lane.b32.xlu1 %v2016_v31, %s2233_s13  ;;  %1985 = vrot.lane.b32.xlu2 %v1976_v58, %s2230_s3  ;;  %v1613_v47 = vpop.f32.mrf.mxu0 }
 0x2a2   :  { %v1579_v36 = vpop.f32.mrf.mxu3  ;;  %v1555_v30 = vpop.f32.mrf.mxu2 }
 0x2a3   :  { %v1580_v55 = vadd.f32 %v1579_v36, %v1551_v48 }
 0x2a4   :  { %2065 = vrot.lane.b32.xlu0 %v2056_v50, %s2232_s12 }
 0x2a5   :  { %v1610_v57 = vadd.f32 %v1609_v59, %v1580_v55  ;;  %v1639_v16 = vpop.f32.mrf.mxu1 }
 0x2a6   :  { %v1727_v63 = vpop.f32.mrf.mxu0 }
 0x2a7   :  { %v2884_v1 = vadd.f32 %v1635_v44, %v1610_v57  ;;  %v1527_v44 = vadd.f32 %v1526_v35, %v1496_v17 }
 0x2a9   :  { %1823 = vrot.lane.b32.xlu2 %v2884_v1, %s2234_s14  ;;  %v1857_v61 = vrot.slane %v2884_v1, 1  ;;  %v1897_v45 = vrot.slane %v2884_v1, 2  ;;  %v1937_v3 = vrot.slane %v2884_v1, 3  ;;  %v1977_v62 = vrot.slane %v2884_v1, 5 }
 0x2aa   :  { %v1585_v27 = vpop.f32.mrf.mxu3  ;;  %v1665_v37 = vpop.f32.mrf.mxu2  ;;  %v2017_v42 = vrot.slane %v2884_v1, 6  ;;  %v2057_v34 = vrot.slane %v2884_v1, 7 }
 0x2ab   :  { %1867 = vrot.lane.b32.xlu1 %v1857_v61, %s2229_s1 }
 0x2ac   :  { %1907 = vrot.lane.b32.xlu0 %v1897_v45, %s2228_s0 }
 0x2ad   :  { %v1756_v8 = vpop.f32.mrf.mxu1 }
 0x2ae   :  { %v1732_v55 = vpop.f32.mrf.mxu0 }
 0x2b1   :  { %1947 = vrot.lane.b32.xlu2 %v1937_v3, %s2231_s11 }
 0x2b2   :  { %v1699_v56 = vpop.f32.mrf.mxu3  ;;  %v1673_v46 = vpop.f32.mrf.mxu2 }
 0x2b3   :  { %1987 = vrot.lane.b32.xlu1 %v1977_v62, %s2230_s3  ;;  %v1700_v11 = vadd.f32 %v1699_v56, %v1665_v37  ;;  %v1556_v62 = vadd.f32 %v1555_v30, %v1527_v44 }
 0x2b4   :  { %2027 = vrot.lane.b32.xlu0 %v2017_v42, %s2233_s13 }
 0x2b5   :  { %v1728_v29 = vadd.f32 %v1727_v63, %v1700_v11  ;;  %v1762_v45 = vpop.f32.mrf.mxu1  ;;  %v1586_v17 = vadd.f32 %v1585_v27, %v1556_v62 }
 0x2b7   :  { %v1757_v39 = vadd.f32 %v1756_v8, %v1728_v29  ;;  %v2127_v29 = vld [vmem:[#allocation2] sm:$0x1] }
 0x2b9   :  { %2067 = vrot.lane.b32.xlu2 %v2057_v34, %s2232_s12 }
 0x2ba   :  { %v1703_v6 = vpop.f32.mrf.mxu3  ;;  %v1786_v28 = vpop.f32.mrf.mxu2 }
 0x2bb   :  { %v1787_v15 = vadd.f32 %v1786_v28, %v1757_v39  ;;  %v1704_v36 = vadd.f32 %v1703_v6, %v1673_v46  ;;  %v1437_v46 = vadd.f32 %v2864_v25, %v2862_v18  ;;  %v1614_v6 = vadd.f32 %v1613_v47, %v1586_v17 }
 0x2bd   :  { %v1733_v57 = vadd.f32 %v1732_v55, %v1704_v36  ;;  %v1463_v34 = vadd.f32 %v2874_v43, %v1437_v46  ;;  %v1640_v30 = vadd.f32 %v1639_v16, %v1614_v6  ;;  %v2193_v55 = vld [vmem:[%s3139_s2 + $0x8] sm:$0xff] }
 0x2bf   :  { %v1763_v56 = vadd.f32 %v1762_v45, %v1733_v57 }
 0x2c2   :  { %v1812_v31 = vpop.f32.mrf.mxu3  ;;  %v1790_v3 = vpop.f32.mrf.mxu2 }
 0x2c3   :  { %v2900_v58 = vadd.f32 %v1812_v31, %v1787_v15  ;;  %v1791_v35 = vadd.f32 %v1790_v3, %v1763_v56 }
 0x2c5   :  { %1825 = vrot.lane.b32.xlu1 %v2900_v58, %s2234_s14  ;;  %v1898_v48 = vrot.slane %v2900_v58, 2  ;;  %v1858_v59 = vrot.slane %v2900_v58, 1  ;;  %v1938_v50 = vrot.slane %v2900_v58, 3  ;;  %v2018_v61 = vrot.slane %v2900_v58, 6 }
 0x2c6   :  { %v1978_v37 = vrot.slane %v2900_v58, 5  ;;  %v2058_v11 = vrot.slane %v2900_v58, 7 }
 0x2c7   :  { %1909 = vrot.lane.b32.xlu2 %v1898_v48, %s2228_s0  ;;  %1869 = vrot.lane.b32.xlu0 %v1858_v59, %s2229_s1 }
 0x2ca   :  { %v1816_v42 = vpop.f32.mrf.mxu3  ;;  %v1904_v25 = vpop.permute.xlu2 %1903 }
 0x2cb   :  { %v1817_v63 = vadd.f32 %v1816_v42, %v1791_v35 }
 0x2cd   :  { %1949 = vrot.lane.b32.xlu1 %v1938_v50, %s2231_s11 }
 0x2cf   :  { %2029 = vrot.lane.b32.xlu2 %v2018_v61, %s2233_s13  ;;  %1989 = vrot.lane.b32.xlu0 %v1978_v37, %s2230_s3 }
 0x2d2   :  { %v2926_v43 = vpop.permute.xlu2 %2023 }
 0x2d5   :  { %2069 = vrot.lane.b32.xlu1 %v2058_v11, %s2232_s12 }
 0x2d7   :  { %2097 = vrot.lane.b32.xlu2 %v1463_v34, %s2235_s15  ;;  %2101 = vrot.lane.b32.xlu0 %v1817_v63, %s2235_s15 }
 0x2dd   :  { %2099 = vrot.lane.b32.xlu1 %v1640_v30, %s2235_s15 }
 0x2df   :  { %2130 = vperm.xlu2 %2187, %v2127_v29  }
 0x2e0   :  { %v1820_v27 = vpop.permute.xlu1 %1819 }
 0x2e2   :  { %v2922_v18 = vpop.permute.xlu0 %1863 }
 0x2e8   :  { %v2928_v28 = vpop.permute.xlu1 %1943 }
 0x2ea   :  { %v2924_v8 = vpop.permute.xlu0 %1983 }
 0x2f0   :  { %v1866_v47 = vpop.permute.xlu2 %1865  ;;  %v2932_v15 = vpop.permute.xlu1 %2063 }
 0x2f1   :  { %v1873_v16 = vsel %vm170_vm11, %v2922_v18, %v1866_v47 }
 0x2f2   :  { %v2930_v39 = vpop.permute.xlu0 %2095  ;;  %v1876_v36 = vmul.f32 %v1873_v16, %v180_v21 }
 0x2f4   :  { %v1884_v37 = vrot.slane %v1876_v36, 4 }
 0x2f8   :  { %v2937_v48 = vpop.permute.xlu2 %1985 }
 0x303   :  { %v1824_v42 = vpop.permute.xlu2 %1823 }
 0x306   :  { %v1822_v31 = vpop.permute.xlu0 %1821 }
 0x307   :  { %v1829_v59 = vsel %vm153_vm13, %v1820_v27, %v1822_v31  ;;  %v1828_v36 = vsel %vm153_vm13, %v1822_v31, %v1824_v42 }
 0x308   :  { %v1832_v50 = vmul.f32 %v2193_v55, %v1829_v59  ;;  %v1906_v44 = vpop.permute.xlu1 %1905 }
 0x309   :  { %v1913_v57 = vsel %vm199_vm12, %v1904_v25, %v1906_v44 }
 0x30a   :  { %v1840_v61 = vrot.slane %v1832_v50, 4  ;;  %v1916_v3 = vmul.f32 %v1913_v57, %v205_v38  ;;  %v2194_v57 = vld [vmem:[%s3139_s2 + $0x10] sm:$0xff] }
 0x30b   :  { %v1948_v63 = vpop.permute.xlu2 %1947 }
 0x30c   :  { %v1848_v45 = vadd.f32 %v1840_v61, %v2866_v0  ;;  %v1924_v46 = vrot.slane %v1916_v3, 4  ;;  %v1833_v61 = vmul.f32 %v2194_v57, %v1828_v36 }
 0x30e   :  { %v1892_v62 = vadd.f32 %v1884_v37, %v1848_v45  ;;  %v1946_v56 = vpop.permute.xlu0 %1945 }
 0x30f   :  { %v1953_v21 = vsel %vm224_vm14, %v2928_v28, %v1946_v56  ;;  %v1952_v45 = vsel %vm224_vm14, %v1946_v56, %v1948_v63 }
 0x310   :  { %v1956_v17 = vmul.f32 %v1953_v21, %v230_v33  ;;  %v1932_v35 = vadd.f32 %v1924_v46, %v1892_v62  ;;  %v2958_v0 = vpop.permute.xlu1 %2025  ;;  %v1993_v33 = vsel %vm249_vm15, %v2924_v8, %v2937_v48 }
 0x311   :  { %v2976_v50 = vmul.f32 %v1993_v33, %v254_v26  ;;  %v1841_v26 = vrot.slane %v1833_v61, 4  ;;  %v2196_v33 = vld [vmem:[%s3139_s2 + $0x18] sm:$0xff] }
 0x312   :  { %v1964_v11 = vrot.slane %v1956_v17, 4  ;;  %v2994_v17 = vmul.f32 %v1952_v45, %v231_v51  ;;  %v2195_v51 = vld [vmem:[%s3139_s2] sm:$0xff] }
 0x313   :  { %v2962_v38 = vpop.permute.xlu2 %2067  ;;  %v2003_v62 = vrot.slane %v2976_v50, 4 }
 0x314   :  { %v2956_v34 = vadd.f32 %v1964_v11, %v1932_v35 }
 0x316   :  { %v2960_v6 = vpop.permute.xlu0 %2065 }
 0x31d   :  { %v1868_v30 = vpop.permute.xlu1 %1867 }
 0x31e   :  { %v1908_v29 = vpop.permute.xlu0 %1907  ;;  %v1872_v37 = vsel %vm170_vm11, %v1866_v47, %v1868_v30  ;;  %v2033_v47 = vsel %vm274_vm5, %v2926_v43, %v2958_v0 }
 0x31f   :  { %v1877_v31 = vmul.f32 %v1872_v37, %v181_v49  ;;  %v1912_v21 = vsel %vm199_vm12, %v1906_v44, %v1908_v29 }
 0x321   :  { %v1910_v16 = vpop.permute.xlu2 %1909  ;;  %v1885_v57 = vrot.slane %v1877_v31, 4  ;;  %v1849_v31 = vadd.f32 %v1841_v26, %v2884_v1  ;;  %v3154_v1 = vrot.slane %v2405_v4, 6 }
 0x322   :  { %v1911_v35 = vsel %vm199_vm12, %v1908_v29, %v1910_v16  ;;  %v1914_v44 = vsel %vm199_vm12, %v1910_v16, %v1904_v25 }
 0x323   :  { %v2035_v26 = vmul.f32 %v2033_v47, %v3154_v1 }
 0x325   :  { %v2964_v59 = vpop.permute.xlu1 %1987 }
 0x326   :  { %v2972_v55 = vpop.permute.xlu0 %2027 }
 0x329   :  { %v2987_v3 = vpop.permute.xlu2 %2029 }
 0x32a   :  { %v2031_v1 = vsel %vm274_vm5, %v2972_v55, %v2987_v3 }
 0x331   :  { %v3049_v47 = vpop.permute.xlu2 %2097 }
 0x337   :  { %v1826_v46 = vpop.permute.xlu1 %1825 }
 0x338   :  { %v1827_v49 = vsel %vm153_vm13, %v1824_v42, %v1826_v46  ;;  %v1830_v56 = vsel %vm153_vm13, %v1826_v46, %v1820_v27  ;;  %v1917_v27 = vmul.f32 %v1912_v21, %v206_v40  ;;  %v1915_v40 = vmul.f32 %v1914_v44, %v204_v9 }
 0x339   :  { %v1831_v11 = vmul.f32 %v2195_v51, %v1830_v56  ;;  %v1834_v36 = vmul.f32 %v2196_v33, %v1827_v49  ;;  %v1870_v42 = vpop.permute.xlu0 %1869  ;;  %v3153_v21 = vrot.slane %v2601_v32, 2  ;;  %v2073_v9 = vsel %vm299_vm4, %v2932_v15, %v2960_v6 }
 0x33a   :  { %v1871_v29 = vsel %vm170_vm11, %v1868_v30, %v1870_v42  ;;  %v1874_v25 = vsel %vm170_vm11, %v1870_v42, %v2922_v18  ;;  %v1992_v18 = vsel %vm249_vm15, %v2937_v48, %v2964_v59  ;;  %v1925_v44 = vrot.slane %v1917_v27, 4 }
 0x33b   :  { %v1839_v16 = vrot.slane %v1831_v11, 4  ;;  %v1842_v61 = vrot.slane %v1834_v36, 4  ;;  %v1875_v37 = vmul.f32 %v1874_v25, %v179_v7  ;;  %v1878_v45 = vmul.f32 %v1871_v29, %v182_v41 }
 0x33c   :  { %v1918_v30 = vmul.f32 %v1911_v35, %v3153_v21  ;;  %v1965_v41 = vrot.slane %v2994_v17, 4  ;;  %v1893_v35 = vadd.f32 %v1885_v57, %v1849_v31  ;;  %v1923_v11 = vrot.slane %v1915_v40, 4 }
 0x33d   :  { %v1847_v46 = vadd.f32 %v1839_v16, %v2845_v14  ;;  %v1850_v7 = vadd.f32 %v1842_v61, %v2900_v58  ;;  %v1883_v49 = vrot.slane %v1875_v37, 4  ;;  %v1886_v56 = vrot.slane %v1878_v45, 4 }
 0x33e   :  { %v2034_v14 = vsel %vm274_vm5, %v2987_v3, %v2926_v43  ;;  %v3155_v17 = vrot.slane %v2492_v54, 5  ;;  %v1926_v57 = vrot.slane %v1918_v30, 4  ;;  %v2032_v43 = vsel %vm274_vm5, %v2958_v0, %v2972_v55 }
 0x33f   :  { %v1891_v58 = vadd.f32 %v1883_v49, %v1847_v46  ;;  %v1894_v48 = vadd.f32 %v1886_v56, %v1850_v7  ;;  %v1950_v51 = vpop.permute.xlu1 %1949  ;;  %v3156_v27 = vrot.slane %v2405_v4, 3  ;;  %v1933_v30 = vadd.f32 %v1925_v44, %v1893_v35 }
 0x340   :  { %v1996_v33 = vmul.f32 %v1992_v18, %v3155_v17  ;;  %v1951_v36 = vsel %vm224_vm14, %v1948_v63, %v1950_v51  ;;  %v1954_v42 = vsel %vm224_vm14, %v1950_v51, %v2928_v28  ;;  %v2038_v63 = vmul.f32 %v2034_v14, %v282_v12 }
 0x341   :  { %v1955_v29 = vmul.f32 %v1954_v42, %v3156_v27  ;;  %v1958_v25 = vmul.f32 %v1951_v36, %v232_v22  ;;  %v1990_v16 = vpop.permute.xlu0 %1989  ;;  %v1931_v61 = vadd.f32 %v1923_v11, %v1891_v58  ;;  %v1934_v0 = vadd.f32 %v1926_v57, %v1894_v48  ;;  %v2131_v36 = vpop.permute.xlu2 %2130  ;;  %v2198_v57 = vld [vmem:[%s3139_s2 + $0x38] sm:$0x1] }
 0x342   :  { %v1991_v28 = vsel %vm249_vm15, %v2964_v59, %v1990_v16  ;;  %v1994_v37 = vsel %vm249_vm15, %v1990_v16, %v2924_v8  ;;  %v3157_v22 = vrot.slane %v2405_v4, 7  ;;  %v2004_v12 = vrot.slane %v1996_v33, 4 }
 0x343   :  { %v1963_v45 = vrot.slane %v1955_v29, 4  ;;  %v1966_v31 = vrot.slane %v1958_v25, 4  ;;  %v1998_v40 = vmul.f32 %v1994_v37, %v257_v13  ;;  %v2105_v59 = vsel %vm324_vm10, %v2930_v39, %v3049_v47 }
 0x344   :  { %v2075_v21 = vmul.f32 %v2073_v9, %v3157_v22  ;;  %v1997_v8 = vmul.f32 %v1991_v28, %v256_v5  ;;  %v2043_v49 = vrot.slane %v2035_v26, 4  ;;  %v2072_v4 = vsel %vm299_vm4, %v2960_v6, %v2962_v38  ;;  %v2197_v5 = vld [vmem:[%s3139_s2 + $0x20] sm:$0x1] }
 0x345   :  { %v1971_v18 = vadd.f32 %v1963_v45, %v1931_v61  ;;  %v1974_v46 = vadd.f32 %v1966_v31, %v1934_v0  ;;  %v2006_v7 = vrot.slane %v1998_v40, 4  ;;  %v3158_v13 = vrot.slane %v2492_v54, 6 }
 0x346   :  { %v2046_v9 = vrot.slane %v2038_v63, 4  ;;  %v2107_v35 = vmul.f32 %v2197_v5, %v2105_v59  ;;  %v2083_v6 = vrot.slane %v2075_v21, 4  ;;  %v1973_v58 = vadd.f32 %v1965_v41, %v1933_v30  ;;  %v2200_v30 = vld [vmem:[%s3139_s2 + $0x30] sm:$0x1] }
 0x347   :  { %v2036_v56 = vmul.f32 %v2032_v43, %v3158_v13  ;;  %v2011_v26 = vadd.f32 %v2003_v62, %v1971_v18  ;;  %v2014_v44 = vadd.f32 %v2006_v7, %v1974_v46  ;;  %v2070_v14 = vpop.permute.xlu1 %2069  ;;  %v2012_v3 = vadd.f32 %v2004_v12, %v2956_v34 }
 0x348   :  { %v2071_v48 = vsel %vm299_vm4, %v2962_v38, %v2070_v14  ;;  %v2074_v55 = vsel %vm299_vm4, %v2070_v14, %v2932_v15  ;;  %v2005_v11 = vrot.slane %v1997_v8, 4  ;;  %v2037_v62 = vmul.f32 %v2031_v1, %v281_v60 }
 0x349   :  { %v2051_v51 = vadd.f32 %v2043_v49, %v2011_v26  ;;  %v2054_v17 = vadd.f32 %v2046_v9, %v2014_v44  ;;  %v2102_v33 = vpop.permute.xlu0 %2101  ;;  %v2044_v50 = vrot.slane %v2036_v56, 4  ;;  %v2078_v41 = vmul.f32 %v2074_v55, %v307_v53 }
 0x34a   :  { %v2106_v38 = vsel %vm324_vm10, %v2102_v33, %v2930_v39  ;;  %v2115_v42 = vrot.slane %v2107_v35, 4  ;;  %v2077_v34 = vmul.f32 %v2071_v48, %v306_v52  ;;  %v3159_v60 = vrot.slane %v2492_v54, 7 }
 0x34b   :  { %v2091_v15 = vadd.f32 %v2083_v6, %v2051_v51  ;;  %v2110_v43 = vmul.f32 %v2198_v57, %v2106_v38  ;;  %v2086_v29 = vrot.slane %v2078_v41, 4  ;;  %v2133_v32 = vperm.slane %v2131_v36, 0 }
 0x34c   :  { %v2076_v27 = vmul.f32 %v2072_v4, %v3159_v60  ;;  %v2013_v25 = vadd.f32 %v2005_v11, %v1973_v58  ;;  %v2148_v39 = vrot.slane %v2299_v20, 4  ;;  %v2052_v63 = vadd.f32 %v2044_v50, %v2012_v3  ;;  %v2199_v20 = vld [vmem:[%s3139_s2 + $0x28] sm:$0x1] }
 0x34d   :  { %v2123_v53 = vadd.f32 %v2115_v42, %v2091_v15  ;;  %v2118_v16 = vrot.slane %v2110_v43, 4  ;;  %v2094_v61 = vadd.f32 %v2086_v29, %v2054_v17  ;;  %v2045_v52 = vrot.slane %v2037_v62, 4 }
 0x34e   :  { %v2085_v37 = vrot.slane %v2077_v34, 4  ;;  %v2084_v45 = vrot.slane %v2076_v27, 4  ;;  %v2141_v59 = vrot.slane %v2302_v23, 4  ;;  %v2149_v49 = vrot.slane %v2297_v19, 4 }
 0x34f   :  { %v2134_v28 = vadd.f32 %v2133_v32, %v2123_v53  ;;  %v2100_v0 = vpop.permute.xlu1 %2099  ;;  %v2126_v31 = vadd.f32 %v2118_v16, %v2094_v61  ;;  %v2053_v21 = vadd.f32 %v2045_v52, %v2013_v25  ;;  %v3160_v14 = vlaneseq }
 0x350   :  { %v2103_v54 = vsel %vm324_vm10, %v2100_v0, %v2102_v33  ;;  %v2104_v40 = vsel %vm324_vm10, %v3049_v47, %v2100_v0  ;;  %v2092_v46 = vadd.f32 %v2084_v45, %v2052_v63 }
 0x351   :  { %v2144_v22 = vmul.f32 %v2140_v10, %v2134_v28  ;;  %v2108_v24 = vmul.f32 %v2199_v20, %v2104_v40  ;;  %v2109_v12 = vmul.f32 %v2200_v30, %v2103_v54  ;;  %v2137_v18 = vadd.f32 %v2133_v32, %v2126_v31 }
 0x352   :  { %v2093_v7 = vadd.f32 %v2085_v37, %v2053_v21  ;;  %vm2169_vm11 = vcmp.lt.s32.totalorder %v3160_v14, 512 }
 0x353   :  { %v2152_v8 = vadd.f32 %v2148_v39, %v2144_v22  ;;  %v2116_v2 = vrot.slane %v2108_v24, 4  ;;  %v2117_v47 = vrot.slane %v2109_v12, 4  ;;  %v2147_v4 = vmul.f32 %v2141_v59, %v2137_v18 }
 0x355   :  { %2160 = vst [vmem:[#allocation1] sm:$0xff] %v2152_v8  ;;  %v2124_v13 = vadd.f32 %v2116_v2, %v2092_v46  ;;  %v2125_v56 = vadd.f32 %v2117_v47, %v2093_v7  ;;  %v2155_v1 = vadd.f32 %v2149_v49, %v2147_v4 }
 0x357   :  { %v2135_v9 = vadd.f32 %v2133_v32, %v2124_v13  ;;  %v2136_v5 = vadd.f32 %v2133_v32, %v2125_v56  ;;  %2163 = vst [vmem:[#allocation1 + $0x1b] sm:$0xff] %v2155_v1 }
 0x359   :  { %v2145_v35 = vmul.f32 %v2140_v10, %v2135_v9  ;;  %v2146_v26 = vmul.f32 %v2141_v59, %v2136_v5 }
 0x35b   :  { %v2153_v44 = vadd.f32 %v2148_v39, %v2145_v35  ;;  %v2154_v23 = vadd.f32 %v2149_v49, %v2146_v26 }
 0x35d   :  { %2161 = vst [vmem:[#allocation1 + $0x9] sm:$0xff] %v2153_v44 }
 0x35e   :  { %2162 = vst [vmem:[#allocation1 + $0x12] sm:$0xff] %v2154_v23 }
 0x365   :  { %v2165_v6 = vld [vmem:[#allocation1 + $0x4] ss:$9 sm:$0xff] }
 0x366   :  { %2171 = vst.msk [vmem:[%s3144_s7] sm:$0xf] %vm2169_vm11, %v2165_v6 }
 0x367   :  { %2176 = vsyncpa [#allocation4], 1 }

</bundles_post_ra>
